<compile_context>
chip_gen: v5e
topology: v5e:2x2
jax: 0.10.0
libtpu: 0.0.40
codegen_flags: <defaults>
</compile_context>

<pallas_src>
import math

import jax
import jax.numpy as jnp
from jax import lax
from jax.experimental import pallas as pl
from jax.experimental.pallas import tpu as pltpu

# ----------------------- small synthetic sizes --------------------------------
B = 2          # batch ("f"/facts axis)
S = 16         # sequence length (orig 512; law_prob is Linear(S, 1))
H = 64         # hidden size (orig 768)
NH = 4         # attention heads in the BERT stand-in
HD = H // NH
FF = 128       # FFN intermediate size
VOCAB = 128
TYPE_VOCAB = 2
MAX_POS = 64
LAW_CLS = 8    # orig 103
ACCU_CLS = 12  # orig 119
TERM_CLS = 11
R = 16         # tokens per law article (law_embs second axis); L*R = 128 (lane-dense)

VMEM = pltpu.MemorySpace.VMEM


# ----------------------- helpers (used inside kernels) ------------------------
def _ct_last(a, b):
    """a[..., K] x b[N, K] -> [..., N]  (PyTorch nn.Linear: y = x @ W.T)."""
    return lax.dot_general(a, b, (((a.ndim - 1,), (1,)), ((), ())),
                           preferred_element_type=jnp.float32)


def _softmax_last(x):
    m = jnp.max(x, axis=-1, keepdims=True)
    e = jnp.exp(x - m)
    return e * pl.reciprocal(jnp.sum(e, axis=-1, keepdims=True), approx=True)


def _layernorm(x, g, b, eps=1e-12):
    mu = jnp.mean(x, axis=-1, keepdims=True)
    var = jnp.mean((x - mu) ** 2, axis=-1, keepdims=True)
    return (x - mu) * lax.rsqrt(var + eps) * g + b


# ----------------------- Pallas kernels ----------------------------------------
def _bert_layer_kernel(x_ref, maskb_ref, wqkv_ref, bqkv_ref, wo_ref, bo_ref,
                       g1_ref, be1_ref, w1_ref, b1_ref, w2_ref, b2_ref,
                       g2_ref, be2_ref, o_ref):
    """One transformer encoder layer, batched over B*S rows."""
    x2 = x_ref[...]                                          # [B*S, H]
    qkv = _ct_last(x2, wqkv_ref[...]) + bqkv_ref[...]        # one fused QKV matmul
    q = qkv[:, 0 * H:1 * H].reshape(B, S, H)
    k = qkv[:, 1 * H:2 * H].reshape(B, S, H)
    v = qkv[:, 2 * H:3 * H].reshape(B, S, H)
    mb = maskb_ref[...]                                      # [B, 1, S] additive bias
    wo = wo_ref[...]
    inv = 1.0 / math.sqrt(HD)

    # Per-head attention, batched over B via a single-batch-dim einsum.
    # sum_h (oh_h @ Wo[:, h*HD:(h+1)*HD].T) == concat(heads) @ Wo.T (exact).
    attn = jnp.zeros((B * S, H), jnp.float32)
    for h in range(NH):
        sl = slice(h * HD, (h + 1) * HD)
        sc = jnp.einsum('bqd,bkd->bqk', q[:, :, sl], k[:, :, sl],
                        preferred_element_type=jnp.float32) * inv + mb
        p = _softmax_last(sc)                                # [B, S, S]
        oh = jnp.einsum('bqk,bkd->bqd', p, v[:, :, sl],
                        preferred_element_type=jnp.float32)  # [B, S, HD]
        attn = attn + _ct_last(oh.reshape(B * S, HD), wo[:, sl])
    attn = attn + bo_ref[...]

    x1 = _layernorm(x2 + attn, g1_ref[...], be1_ref[...])
    # TODO(synk): tanh-approx GELU; PyTorch/BERT default is the exact erf form.
    ff = jax.nn.gelu(_ct_last(x1, w1_ref[...]) + b1_ref[...], approximate=True)
    ff = _ct_last(ff, w2_ref[...]) + b2_ref[...]
    o_ref[...] = _layernorm(x1 + ff, g2_ref[...], be2_ref[...])


def _law_heads_kernel(emb_ref, cls_ref, lawsall_ref,
                      fqw_ref, fqb_ref, lk_ref, mask_ref, vd_ref, seg_ref,
                      bd_ref, wsel_ref, blp_ref,
                      wl_ref, bl_ref, wr_ref, br_ref, wf_ref, bf_ref,
                      wa_ref, ba_ref, wt_ref, bt_ref,
                      law_ref, accu_ref, term_ref, lang_ref):
    """
    Fused:  facts_q = fact_q(embeddings)
            relevance = softmax_r(einsum('fsd,lrd->flsr', facts_q, laws_k)/sqrt(H)
                                  + law_masks)
            d       = d_prob(relevance @ laws_v)          (fused: vd = laws_v @ wd)
            scores  = law_prob(d)
            law     = rule_law(law(cls)) + fact_law(scores)
            accu/term heads; law(cls) for every cached law vector.
    All (b, l) pairs handled by lane-dense [B*S, L*R=128] matmuls; per-law
    softmax uses a global row shift (softmax is shift-invariant) and segment
    sums computed as matmuls against a one-hot segment matrix.
    """
    inv = 1.0 / math.sqrt(H)
    emb2 = emb_ref[...]                                            # [B*S, H]
    fq = _ct_last(emb2, fqw_ref[...]) + fqb_ref[...]               # [B*S, H]
    s = _ct_last(fq, lk_ref[...]) * inv + mask_ref[...]            # [B*S, L*R]
    m = jnp.max(s, axis=-1, keepdims=True)                         # row shift
    e = jnp.exp(s - m)
    seg = seg_ref[...]                                             # [L*R, L] one-hot
    den = jnp.dot(e, seg, preferred_element_type=jnp.float32)      # per-law sum_r exp
    num = jnp.dot(e * vd_ref[...], seg,
                  preferred_element_type=jnp.float32)              # sum_r exp * vd
    d = num * pl.reciprocal(den, approx=True) + bd_ref[...]        # [B*S, L]
    # scores[b, l] = sum_s law_prob_w[s] * d[b*S+s, l]  via block-diagonal wsel
    scores = jnp.dot(wsel_ref[...], d,
                     preferred_element_type=jnp.float32) + blp_ref[...]   # [B, L]

    cls = cls_ref[...]
    law0 = _ct_last(cls, wl_ref[...]) + bl_ref[...]                # self.law(cls)
    law_ref[...] = (_ct_last(law0, wr_ref[...]) + br_ref[...]      # rule_law(law)
                    + _ct_last(scores, wf_ref[...]) + bf_ref[...]) # + fact_law(scores)
    accu_ref[...] = _ct_last(cls, wa_ref[...]) + ba_ref[...]
    term_ref[...] = _ct_last(cls, wt_ref[...]) + bt_ref[...]
    # self.law(laws) for every cached law vector; gathered by argmax in wrapper
    lang_ref[...] = _ct_last(lawsall_ref[...], wl_ref[...]) + bl_ref[...]


# ----------------------- parameters (deterministic init) -----------------------
def init_params(key):
    def nrm(k, shape, scale=0.02):
        return (scale * jax.random.normal(k, shape)).astype(jnp.float32)

    keys = iter(jax.random.split(key, 64))
    p = {}
    # TODO(synk): pretrained bert-base-chinese weights / pickle buffers are not
    # loadable here; replaced by deterministic random init of a 1-layer stand-in.
    p["word_emb"] = nrm(next(keys), (VOCAB, H))
    p["pos_emb"] = nrm(next(keys), (MAX_POS, H))
    p["type_emb"] = nrm(next(keys), (TYPE_VOCAB, H))
    p["emb_ln_g"] = jnp.ones((H,), jnp.float32)
    p["emb_ln_b"] = jnp.zeros((H,), jnp.float32)

    # one encoder layer
    for name, shape in [("wq", (H, H)), ("wk", (H, H)), ("wv", (H, H)),
                        ("wo", (H, H)), ("w1", (FF, H)), ("w2", (H, FF))]:
        p[name] = nrm(next(keys), shape)
    for name, n in [("bq", H), ("bk", H), ("bv", H), ("bo", H), ("b1", FF), ("b2", H)]:
        p[name] = jnp.zeros((n,), jnp.float32)
    for name in ["ln1_g", "ln2_g"]:
        p[name] = jnp.ones((H,), jnp.float32)
    for name in ["ln1_b", "ln2_b"]:
        p[name] = jnp.zeros((H,), jnp.float32)

    # task heads / law-relevance parameters (shapes follow the module __init__)
    p["law_k_w"] = nrm(next(keys), (H, H));        p["law_k_b"] = jnp.zeros((H,), jnp.float32)
    p["fact_q_w"] = nrm(next(keys), (H, H));       p["fact_q_b"] = jnp.zeros((H,), jnp.float32)
    p["law_v_w"] = nrm(next(keys), (H, H));        p["law_v_b"] = jnp.zeros((H,), jnp.float32)
    p["law_prob_w"] = nrm(next(keys), (1, S));     p["law_prob_b"] = jnp.zeros((1,), jnp.float32)
    p["d_prob_w"] = nrm(next(keys), (1, H));       p["d_prob_b"] = jnp.zeros((1,), jnp.float32)
    p["fact_law_w"] = nrm(next(keys), (LAW_CLS, LAW_CLS)); p["fact_law_b"] = jnp.zeros((LAW_CLS,), jnp.float32)
    p["rule_law_w"] = nrm(next(keys), (LAW_CLS, LAW_CLS)); p["rule_law_b"] = jnp.zeros((LAW_CLS,), jnp.float32)
    p["law_w"] = nrm(next(keys), (LAW_CLS, H));    p["law_b"] = jnp.zeros((LAW_CLS,), jnp.float32)
    p["accu_w"] = nrm(next(keys), (ACCU_CLS, H));  p["accu_b"] = jnp.zeros((ACCU_CLS,), jnp.float32)
    p["term_w"] = nrm(next(keys), (TERM_CLS, H));  p["term_b"] = jnp.zeros((TERM_CLS,), jnp.float32)

    # buffers that the original module loads from pickles
    p["law_embs"] = nrm(next(keys), (LAW_CLS, R, H))          # per-law token embeddings
    r_idx = jnp.arange(R)[None, None, :]
    l_idx = jnp.arange(LAW_CLS)[:, None, None]
    # mask the last few law tokens for odd-indexed laws (additive -1e4 bias)
    p["law_masks"] = jnp.where((l_idx % 2 == 1) & (r_idx >= R - 4), -10000.0, 0.0).astype(jnp.float32)
    p["laws"] = nrm(next(keys), (LAW_CLS, H))                 # cached law [CLS] vectors
    return p


def precompute(p):
    """Parameter-only derived tensors, hoisted out of forward() (run once)."""
    le2 = p["law_embs"].reshape(LAW_CLS * R, H)
    lawsk = le2 @ p["law_k_w"].T + p["law_k_b"]                       # [L*R, H]
    lawsv = le2 @ p["law_v_w"].T + p["law_v_b"]                       # [L*R, H]
    vd_flat = (lawsv @ p["d_prob_w"][0]).reshape(1, LAW_CLS * R)      # laws_v . d_prob
    mask_flat = p["law_masks"].reshape(1, LAW_CLS * R)
    seg = (jnp.arange(LAW_CLS * R)[:, None] // R ==
           jnp.arange(LAW_CLS)[None, :]).astype(jnp.float32)          # [L*R, L]
    wsel = jnp.zeros((B, B * S), jnp.float32)                         # block-diag law_prob
    for b in range(B):
        wsel = wsel.at[b, b * S:(b + 1) * S].set(p["law_prob_w"][0])
    wqkv = jnp.concatenate([p["wq"], p["wk"], p["wv"]], axis=0)       # [3H, H]
    bqkv = jnp.concatenate([p["bq"], p["bk"], p["bv"]]).reshape(1, 3 * H)
    return dict(lawsk=lawsk, vd_flat=vd_flat, mask_flat=mask_flat, seg=seg,
                wsel=wsel, wqkv=wqkv, bqkv=bqkv)


# ----------------------- JAX-level glue ----------------------------------------
def bert_embeddings(p, input_ids, token_type_ids):
    pos = jnp.arange(S)[None, :]
    e = p["word_emb"][input_ids] + p["pos_emb"][pos] + p["type_emb"][token_type_ids]
    return _layernorm(e, p["emb_ln_g"], p["emb_ln_b"])


def forward(p, d, input_ids, token_type_ids, attention_mask):
    # output = self.bert(input_ids, token_type_ids, attention_mask)   -> [B, S, H]
    x = bert_embeddings(p, input_ids, token_type_ids)
    mask_bias = (1.0 - attention_mask.astype(jnp.float32))[:, None, :] * -10000.0
    seq2 = pl.pallas_call(
        _bert_layer_kernel,
        out_shape=jax.ShapeDtypeStruct((B * S, H), jnp.float32),
        in_specs=[pl.BlockSpec(memory_space=VMEM)] * 14,
        out_specs=pl.BlockSpec(memory_space=VMEM),
    )(x.reshape(B * S, H), mask_bias,
      d["wqkv"], d["bqkv"], p["wo"], p["bo"].reshape(1, H),
      p["ln1_g"].reshape(1, H), p["ln1_b"].reshape(1, H),
      p["w1"], p["b1"].reshape(1, FF), p["w2"], p["b2"].reshape(1, H),
      p["ln2_g"].reshape(1, H), p["ln2_b"].reshape(1, H))
    output = seq2.reshape(B, S, H)
    cls = output[:, 0, :]                                             # [B, H]

    # facts_q = fact_q(bert.embeddings(input_ids))   (token types default to 0)
    emb_plain = bert_embeddings(p, input_ids, jnp.zeros_like(input_ids))

    # fused: fact_q projection + law relevance + all classification heads
    law, accu, term, all_lang = pl.pallas_call(
        _law_heads_kernel,
        out_shape=(jax.ShapeDtypeStruct((B, LAW_CLS), jnp.float32),
                   jax.ShapeDtypeStruct((B, ACCU_CLS), jnp.float32),
                   jax.ShapeDtypeStruct((B, TERM_CLS), jnp.float32),
                   jax.ShapeDtypeStruct((LAW_CLS, LAW_CLS), jnp.float32)),
        in_specs=[pl.BlockSpec(memory_space=VMEM)] * 22,
        out_specs=(pl.BlockSpec(memory_space=VMEM),) * 4,
    )(emb_plain.reshape(B * S, H), cls, p["laws"],
      p["fact_q_w"], p["fact_q_b"].reshape(1, H),
      d["lawsk"], d["mask_flat"], d["vd_flat"], d["seg"],
      p["d_prob_b"].reshape(1, 1), d["wsel"], p["law_prob_b"].reshape(1, 1),
      p["law_w"], p["law_b"].reshape(1, LAW_CLS),
      p["rule_law_w"], p["rule_law_b"].reshape(1, LAW_CLS),
      p["fact_law_w"], p["fact_law_b"].reshape(1, LAW_CLS),
      p["accu_w"], p["accu_b"].reshape(1, ACCU_CLS),
      p["term_w"], p["term_b"].reshape(1, TERM_CLS))

    law_no = jnp.argmax(law, axis=1).astype(jnp.int32)                # [B]
    # plm=False branch: law_batch = self.laws[law_no]; dropout == identity (eval).
    # self.law(laws[law_no]) == (self.law(laws))[law_no], so gather the precomputed rows.
    law_language_pred = all_lang[law_no]                              # [B, LAW_CLS]
    mlm_loss = jnp.float32(0.0)
    # TODO(synk): plm=True branch (LegalRuleDataset lookup + MLM loss) depends on
    # an external dataset/tokenizer and is not translatable to a kernel.
    return law, accu, term, law_language_pred, mlm_loss, law_no


if __name__ == "__main__":
    key = jax.random.PRNGKey(0)
    pkey, ikey = jax.random.split(key)
    params = init_params(pkey)
    derived = precompute(params)

    input_ids = jax.random.randint(ikey, (B, S), 0, VOCAB, dtype=jnp.int32)
    token_type_ids = jnp.zeros((B, S), jnp.int32)
    attention_mask = jnp.ones((B, S), jnp.int32).at[:, -2:].set(0)

    fwd = jax.jit(forward)
    law, accu, term, law_language_pred, mlm_loss, law_no = fwd(
        params, derived, input_ids, token_type_ids, attention_mask)
    jax.block_until_ready((law, accu, term, law_language_pred, mlm_loss, law_no))

    assert law.shape == (B, LAW_CLS)
    assert accu.shape == (B, ACCU_CLS)
    assert term.shape == (B, TERM_CLS)
    assert law_language_pred.shape == (B, LAW_CLS)
    assert law_no.shape == (B,)
    print("KERNEL_OK")
</pallas_src>

<mosaic_0001>
module attributes {stable_mosaic.version = 11 : i64} {
  func.func @_bert_layer_kernel(%arg0: memref<32x64xf32, #tpu.memory_space<vmem>>, %arg1: memref<2x1x16xf32, #tpu.memory_space<vmem>>, %arg2: memref<192x64xf32, #tpu.memory_space<vmem>>, %arg3: memref<1x192xf32, #tpu.memory_space<vmem>>, %arg4: memref<64x64xf32, #tpu.memory_space<vmem>>, %arg5: memref<1x64xf32, #tpu.memory_space<vmem>>, %arg6: memref<1x64xf32, #tpu.memory_space<vmem>>, %arg7: memref<1x64xf32, #tpu.memory_space<vmem>>, %arg8: memref<128x64xf32, #tpu.memory_space<vmem>>, %arg9: memref<1x128xf32, #tpu.memory_space<vmem>>, %arg10: memref<64x128xf32, #tpu.memory_space<vmem>>, %arg11: memref<1x64xf32, #tpu.memory_space<vmem>>, %arg12: memref<1x64xf32, #tpu.memory_space<vmem>>, %arg13: memref<1x64xf32, #tpu.memory_space<vmem>>, %arg14: memref<32x64xf32, #tpu.memory_space<vmem>>) attributes {dimension_semantics = [], scalar_prefetch = 0 : i64, scratch_operands = 0 : i64, tpu.core_type = #tpu.core_type<tc>} {
    %c0 = arith.constant 0 : index
    %c0_0 = arith.constant 0 : index
    %0 = vector.load %arg0[%c0, %c0_0] : memref<32x64xf32, #tpu.memory_space<vmem>>, vector<32x64xf32>
    %c0_1 = arith.constant 0 : index
    %c0_2 = arith.constant 0 : index
    %1 = vector.load %arg2[%c0_1, %c0_2] : memref<192x64xf32, #tpu.memory_space<vmem>>, vector<192x64xf32>
    %cst = arith.constant dense<0.000000e+00> : vector<32x192xf32>
    %2 = tpu.matmul %0, %1, %cst {dimension_numbers = #tpu.dot_dimension_numbers<[1], [1], [0], [0], [0, 0, 1, 0], [], []>} : vector<32x64xf32>, vector<192x64xf32>, vector<32x192xf32> -> vector<32x192xf32>
    %c0_3 = arith.constant 0 : index
    %c0_4 = arith.constant 0 : index
    %3 = vector.load %arg3[%c0_3, %c0_4] : memref<1x192xf32, #tpu.memory_space<vmem>>, vector<1x192xf32>
    %4 = vector.broadcast %3 : vector<1x192xf32> to vector<32x192xf32>
    %5 = arith.addf %2, %4 : vector<32x192xf32>
    %6 = vector.extract_strided_slice %5 {offsets = [0, 0], sizes = [32, 64], strides = [1, 1]} : vector<32x192xf32> to vector<32x64xf32>
    %7 = vector.shape_cast %6 : vector<32x64xf32> to vector<2x16x64xf32>
    %8 = vector.extract_strided_slice %5 {offsets = [0, 64], sizes = [32, 64], strides = [1, 1]} : vector<32x192xf32> to vector<32x64xf32>
    %9 = vector.shape_cast %8 : vector<32x64xf32> to vector<2x16x64xf32>
    %10 = vector.extract_strided_slice %5 {offsets = [0, 128], sizes = [32, 64], strides = [1, 1]} : vector<32x192xf32> to vector<32x64xf32>
    %11 = vector.shape_cast %10 : vector<32x64xf32> to vector<2x16x64xf32>
    %c0_5 = arith.constant 0 : index
    %c0_6 = arith.constant 0 : index
    %c0_7 = arith.constant 0 : index
    %12 = vector.load %arg1[%c0_5, %c0_6, %c0_7] : memref<2x1x16xf32, #tpu.memory_space<vmem>>, vector<2x1x16xf32>
    %c0_8 = arith.constant 0 : index
    %c0_9 = arith.constant 0 : index
    %13 = vector.load %arg4[%c0_8, %c0_9] : memref<64x64xf32, #tpu.memory_space<vmem>>, vector<64x64xf32>
    %cst_10 = arith.constant 0.000000e+00 : f32
    %14 = vector.broadcast %cst_10 : f32 to vector<32x64xf32>
    %15 = vector.extract_strided_slice %7 {offsets = [0, 0, 0], sizes = [2, 16, 16], strides = [1, 1, 1]} : vector<2x16x64xf32> to vector<2x16x16xf32>
    %16 = vector.extract_strided_slice %9 {offsets = [0, 0, 0], sizes = [2, 16, 16], strides = [1, 1, 1]} : vector<2x16x64xf32> to vector<2x16x16xf32>
    "tpu.trace_start"() <{level = 10 : i32, message = "bqd,bkd->bqk"}> : () -> ()
    %cst_11 = arith.constant dense<0.000000e+00> : vector<2x16x16xf32>
    %17 = tpu.matmul %15, %16, %cst_11 {dimension_numbers = #tpu.dot_dimension_numbers<[2], [2], [1], [1], [0, 0, 0, 1, 1, 1], [0], [0]>} : vector<2x16x16xf32>, vector<2x16x16xf32>, vector<2x16x16xf32> -> vector<2x16x16xf32>
    "tpu.trace_stop"() : () -> ()
    %cst_12 = arith.constant 2.500000e-01 : f32
    %18 = vector.broadcast %cst_12 : f32 to vector<2x16x16xf32>
    %19 = arith.mulf %17, %18 : vector<2x16x16xf32>
    %20 = vector.broadcast %12 : vector<2x1x16xf32> to vector<2x16x16xf32>
    %21 = arith.addf %19, %20 : vector<2x16x16xf32>
    %cst_13 = arith.constant dense<0xFF800000> : vector<2x16xf32>
    %22 = vector.multi_reduction <maximumf>, %21, %cst_13 [2] : vector<2x16x16xf32> to vector<2x16xf32>
    %23 = vector.shape_cast %22 : vector<2x16xf32> to vector<2x16x1xf32>
    %24 = vector.broadcast %23 : vector<2x16x1xf32> to vector<2x16x16xf32>
    %25 = arith.subf %21, %24 : vector<2x16x16xf32>
    %26 = math.exp %25 : vector<2x16x16xf32>
    %cst_14 = arith.constant dense<0.000000e+00> : vector<2x16xf32>
    %27 = vector.multi_reduction <add>, %26, %cst_14 [2] : vector<2x16x16xf32> to vector<2x16xf32>
    %28 = vector.shape_cast %27 : vector<2x16xf32> to vector<2x16x1xf32>
    %29 = tpu.reciprocal %28 {approx = true} : vector<2x16x1xf32> -> vector<2x16x1xf32>
    %30 = vector.broadcast %29 : vector<2x16x1xf32> to vector<2x16x16xf32>
    %31 = arith.mulf %26, %30 : vector<2x16x16xf32>
    %32 = vector.extract_strided_slice %11 {offsets = [0, 0, 0], sizes = [2, 16, 16], strides = [1, 1, 1]} : vector<2x16x64xf32> to vector<2x16x16xf32>
    "tpu.trace_start"() <{level = 10 : i32, message = "bqk,bkd->bqd"}> : () -> ()
    %cst_15 = arith.constant dense<0.000000e+00> : vector<2x16x16xf32>
    %33 = tpu.matmul %31, %32, %cst_15 {dimension_numbers = #tpu.dot_dimension_numbers<[2], [1], [1], [2], [0, 0, 0, 1, 1, 2], [0], [0]>} : vector<2x16x16xf32>, vector<2x16x16xf32>, vector<2x16x16xf32> -> vector<2x16x16xf32>
    "tpu.trace_stop"() : () -> ()
    %34 = vector.shape_cast %33 : vector<2x16x16xf32> to vector<32x16xf32>
    %35 = vector.extract_strided_slice %13 {offsets = [0, 0], sizes = [64, 16], strides = [1, 1]} : vector<64x64xf32> to vector<64x16xf32>
    %cst_16 = arith.constant dense<0.000000e+00> : vector<32x64xf32>
    %36 = tpu.matmul %34, %35, %cst_16 {dimension_numbers = #tpu.dot_dimension_numbers<[1], [1], [0], [0], [0, 0, 1, 0], [], []>} : vector<32x16xf32>, vector<64x16xf32>, vector<32x64xf32> -> vector<32x64xf32>
    %37 = arith.addf %14, %36 : vector<32x64xf32>
    %38 = vector.extract_strided_slice %7 {offsets = [0, 0, 16], sizes = [2, 16, 16], strides = [1, 1, 1]} : vector<2x16x64xf32> to vector<2x16x16xf32>
    %39 = vector.extract_strided_slice %9 {offsets = [0, 0, 16], sizes = [2, 16, 16], strides = [1, 1, 1]} : vector<2x16x64xf32> to vector<2x16x16xf32>
    "tpu.trace_start"() <{level = 10 : i32, message = "bqd,bkd->bqk"}> : () -> ()
    %cst_17 = arith.constant dense<0.000000e+00> : vector<2x16x16xf32>
    %40 = tpu.matmul %38, %39, %cst_17 {dimension_numbers = #tpu.dot_dimension_numbers<[2], [2], [1], [1], [0, 0, 0, 1, 1, 1], [0], [0]>} : vector<2x16x16xf32>, vector<2x16x16xf32>, vector<2x16x16xf32> -> vector<2x16x16xf32>
    "tpu.trace_stop"() : () -> ()
    %cst_18 = arith.constant 2.500000e-01 : f32
    %41 = vector.broadcast %cst_18 : f32 to vector<2x16x16xf32>
    %42 = arith.mulf %40, %41 : vector<2x16x16xf32>
    %43 = vector.broadcast %12 : vector<2x1x16xf32> to vector<2x16x16xf32>
    %44 = arith.addf %42, %43 : vector<2x16x16xf32>
    %cst_19 = arith.constant dense<0xFF800000> : vector<2x16xf32>
    %45 = vector.multi_reduction <maximumf>, %44, %cst_19 [2] : vector<2x16x16xf32> to vector<2x16xf32>
    %46 = vector.shape_cast %45 : vector<2x16xf32> to vector<2x16x1xf32>
    %47 = vector.broadcast %46 : vector<2x16x1xf32> to vector<2x16x16xf32>
    %48 = arith.subf %44, %47 : vector<2x16x16xf32>
    %49 = math.exp %48 : vector<2x16x16xf32>
    %cst_20 = arith.constant dense<0.000000e+00> : vector<2x16xf32>
    %50 = vector.multi_reduction <add>, %49, %cst_20 [2] : vector<2x16x16xf32> to vector<2x16xf32>
    %51 = vector.shape_cast %50 : vector<2x16xf32> to vector<2x16x1xf32>
    %52 = tpu.reciprocal %51 {approx = true} : vector<2x16x1xf32> -> vector<2x16x1xf32>
    %53 = vector.broadcast %52 : vector<2x16x1xf32> to vector<2x16x16xf32>
    %54 = arith.mulf %49, %53 : vector<2x16x16xf32>
    %55 = vector.extract_strided_slice %11 {offsets = [0, 0, 16], sizes = [2, 16, 16], strides = [1, 1, 1]} : vector<2x16x64xf32> to vector<2x16x16xf32>
    "tpu.trace_start"() <{level = 10 : i32, message = "bqk,bkd->bqd"}> : () -> ()
    %cst_21 = arith.constant dense<0.000000e+00> : vector<2x16x16xf32>
    %56 = tpu.matmul %54, %55, %cst_21 {dimension_numbers = #tpu.dot_dimension_numbers<[2], [1], [1], [2], [0, 0, 0, 1, 1, 2], [0], [0]>} : vector<2x16x16xf32>, vector<2x16x16xf32>, vector<2x16x16xf32> -> vector<2x16x16xf32>
    "tpu.trace_stop"() : () -> ()
    %57 = vector.shape_cast %56 : vector<2x16x16xf32> to vector<32x16xf32>
    %58 = vector.extract_strided_slice %13 {offsets = [0, 16], sizes = [64, 16], strides = [1, 1]} : vector<64x64xf32> to vector<64x16xf32>
    %cst_22 = arith.constant dense<0.000000e+00> : vector<32x64xf32>
    %59 = tpu.matmul %57, %58, %cst_22 {dimension_numbers = #tpu.dot_dimension_numbers<[1], [1], [0], [0], [0, 0, 1, 0], [], []>} : vector<32x16xf32>, vector<64x16xf32>, vector<32x64xf32> -> vector<32x64xf32>
    %60 = arith.addf %37, %59 : vector<32x64xf32>
    %61 = vector.extract_strided_slice %7 {offsets = [0, 0, 32], sizes = [2, 16, 16], strides = [1, 1, 1]} : vector<2x16x64xf32> to vector<2x16x16xf32>
    %62 = vector.extract_strided_slice %9 {offsets = [0, 0, 32], sizes = [2, 16, 16], strides = [1, 1, 1]} : vector<2x16x64xf32> to vector<2x16x16xf32>
    "tpu.trace_start"() <{level = 10 : i32, message = "bqd,bkd->bqk"}> : () -> ()
    %cst_23 = arith.constant dense<0.000000e+00> : vector<2x16x16xf32>
    %63 = tpu.matmul %61, %62, %cst_23 {dimension_numbers = #tpu.dot_dimension_numbers<[2], [2], [1], [1], [0, 0, 0, 1, 1, 1], [0], [0]>} : vector<2x16x16xf32>, vector<2x16x16xf32>, vector<2x16x16xf32> -> vector<2x16x16xf32>
    "tpu.trace_stop"() : () -> ()
    %cst_24 = arith.constant 2.500000e-01 : f32
    %64 = vector.broadcast %cst_24 : f32 to vector<2x16x16xf32>
    %65 = arith.mulf %63, %64 : vector<2x16x16xf32>
    %66 = vector.broadcast %12 : vector<2x1x16xf32> to vector<2x16x16xf32>
    %67 = arith.addf %65, %66 : vector<2x16x16xf32>
    %cst_25 = arith.constant dense<0xFF800000> : vector<2x16xf32>
    %68 = vector.multi_reduction <maximumf>, %67, %cst_25 [2] : vector<2x16x16xf32> to vector<2x16xf32>
    %69 = vector.shape_cast %68 : vector<2x16xf32> to vector<2x16x1xf32>
    %70 = vector.broadcast %69 : vector<2x16x1xf32> to vector<2x16x16xf32>
    %71 = arith.subf %67, %70 : vector<2x16x16xf32>
    %72 = math.exp %71 : vector<2x16x16xf32>
    %cst_26 = arith.constant dense<0.000000e+00> : vector<2x16xf32>
    %73 = vector.multi_reduction <add>, %72, %cst_26 [2] : vector<2x16x16xf32> to vector<2x16xf32>
    %74 = vector.shape_cast %73 : vector<2x16xf32> to vector<2x16x1xf32>
    %75 = tpu.reciprocal %74 {approx = true} : vector<2x16x1xf32> -> vector<2x16x1xf32>
    %76 = vector.broadcast %75 : vector<2x16x1xf32> to vector<2x16x16xf32>
    %77 = arith.mulf %72, %76 : vector<2x16x16xf32>
    %78 = vector.extract_strided_slice %11 {offsets = [0, 0, 32], sizes = [2, 16, 16], strides = [1, 1, 1]} : vector<2x16x64xf32> to vector<2x16x16xf32>
    "tpu.trace_start"() <{level = 10 : i32, message = "bqk,bkd->bqd"}> : () -> ()
    %cst_27 = arith.constant dense<0.000000e+00> : vector<2x16x16xf32>
    %79 = tpu.matmul %77, %78, %cst_27 {dimension_numbers = #tpu.dot_dimension_numbers<[2], [1], [1], [2], [0, 0, 0, 1, 1, 2], [0], [0]>} : vector<2x16x16xf32>, vector<2x16x16xf32>, vector<2x16x16xf32> -> vector<2x16x16xf32>
    "tpu.trace_stop"() : () -> ()
    %80 = vector.shape_cast %79 : vector<2x16x16xf32> to vector<32x16xf32>
    %81 = vector.extract_strided_slice %13 {offsets = [0, 32], sizes = [64, 16], strides = [1, 1]} : vector<64x64xf32> to vector<64x16xf32>
    %cst_28 = arith.constant dense<0.000000e+00> : vector<32x64xf32>
    %82 = tpu.matmul %80, %81, %cst_28 {dimension_numbers = #tpu.dot_dimension_numbers<[1], [1], [0], [0], [0, 0, 1, 0], [], []>} : vector<32x16xf32>, vector<64x16xf32>, vector<32x64xf32> -> vector<32x64xf32>
    %83 = arith.addf %60, %82 : vector<32x64xf32>
    %84 = vector.extract_strided_slice %7 {offsets = [0, 0, 48], sizes = [2, 16, 16], strides = [1, 1, 1]} : vector<2x16x64xf32> to vector<2x16x16xf32>
    %85 = vector.extract_strided_slice %9 {offsets = [0, 0, 48], sizes = [2, 16, 16], strides = [1, 1, 1]} : vector<2x16x64xf32> to vector<2x16x16xf32>
    "tpu.trace_start"() <{level = 10 : i32, message = "bqd,bkd->bqk"}> : () -> ()
    %cst_29 = arith.constant dense<0.000000e+00> : vector<2x16x16xf32>
    %86 = tpu.matmul %84, %85, %cst_29 {dimension_numbers = #tpu.dot_dimension_numbers<[2], [2], [1], [1], [0, 0, 0, 1, 1, 1], [0], [0]>} : vector<2x16x16xf32>, vector<2x16x16xf32>, vector<2x16x16xf32> -> vector<2x16x16xf32>
    "tpu.trace_stop"() : () -> ()
    %cst_30 = arith.constant 2.500000e-01 : f32
    %87 = vector.broadcast %cst_30 : f32 to vector<2x16x16xf32>
    %88 = arith.mulf %86, %87 : vector<2x16x16xf32>
    %89 = vector.broadcast %12 : vector<2x1x16xf32> to vector<2x16x16xf32>
    %90 = arith.addf %88, %89 : vector<2x16x16xf32>
    %cst_31 = arith.constant dense<0xFF800000> : vector<2x16xf32>
    %91 = vector.multi_reduction <maximumf>, %90, %cst_31 [2] : vector<2x16x16xf32> to vector<2x16xf32>
    %92 = vector.shape_cast %91 : vector<2x16xf32> to vector<2x16x1xf32>
    %93 = vector.broadcast %92 : vector<2x16x1xf32> to vector<2x16x16xf32>
    %94 = arith.subf %90, %93 : vector<2x16x16xf32>
    %95 = math.exp %94 : vector<2x16x16xf32>
    %cst_32 = arith.constant dense<0.000000e+00> : vector<2x16xf32>
    %96 = vector.multi_reduction <add>, %95, %cst_32 [2] : vector<2x16x16xf32> to vector<2x16xf32>
    %97 = vector.shape_cast %96 : vector<2x16xf32> to vector<2x16x1xf32>
    %98 = tpu.reciprocal %97 {approx = true} : vector<2x16x1xf32> -> vector<2x16x1xf32>
    %99 = vector.broadcast %98 : vector<2x16x1xf32> to vector<2x16x16xf32>
    %100 = arith.mulf %95, %99 : vector<2x16x16xf32>
    %101 = vector.extract_strided_slice %11 {offsets = [0, 0, 48], sizes = [2, 16, 16], strides = [1, 1, 1]} : vector<2x16x64xf32> to vector<2x16x16xf32>
    "tpu.trace_start"() <{level = 10 : i32, message = "bqk,bkd->bqd"}> : () -> ()
    %cst_33 = arith.constant dense<0.000000e+00> : vector<2x16x16xf32>
    %102 = tpu.matmul %100, %101, %cst_33 {dimension_numbers = #tpu.dot_dimension_numbers<[2], [1], [1], [2], [0, 0, 0, 1, 1, 2], [0], [0]>} : vector<2x16x16xf32>, vector<2x16x16xf32>, vector<2x16x16xf32> -> vector<2x16x16xf32>
    "tpu.trace_stop"() : () -> ()
    %103 = vector.shape_cast %102 : vector<2x16x16xf32> to vector<32x16xf32>
    %104 = vector.extract_strided_slice %13 {offsets = [0, 48], sizes = [64, 16], strides = [1, 1]} : vector<64x64xf32> to vector<64x16xf32>
    %cst_34 = arith.constant dense<0.000000e+00> : vector<32x64xf32>
    %105 = tpu.matmul %103, %104, %cst_34 {dimension_numbers = #tpu.dot_dimension_numbers<[1], [1], [0], [0], [0, 0, 1, 0], [], []>} : vector<32x16xf32>, vector<64x16xf32>, vector<32x64xf32> -> vector<32x64xf32>
    %106 = arith.addf %83, %105 : vector<32x64xf32>
    %c0_35 = arith.constant 0 : index
    %c0_36 = arith.constant 0 : index
    %107 = vector.load %arg5[%c0_35, %c0_36] : memref<1x64xf32, #tpu.memory_space<vmem>>, vector<1x64xf32>
    %108 = vector.broadcast %107 : vector<1x64xf32> to vector<32x64xf32>
    %109 = arith.addf %106, %108 : vector<32x64xf32>
    %110 = arith.addf %0, %109 : vector<32x64xf32>
    %c0_37 = arith.constant 0 : index
    %c0_38 = arith.constant 0 : index
    %111 = vector.load %arg6[%c0_37, %c0_38] : memref<1x64xf32, #tpu.memory_space<vmem>>, vector<1x64xf32>
    %c0_39 = arith.constant 0 : index
    %c0_40 = arith.constant 0 : index
    %112 = vector.load %arg7[%c0_39, %c0_40] : memref<1x64xf32, #tpu.memory_space<vmem>>, vector<1x64xf32>
    %cst_41 = arith.constant dense<0.000000e+00> : vector<32xf32>
    %113 = vector.multi_reduction <add>, %110, %cst_41 [1] : vector<32x64xf32> to vector<32xf32>
    %114 = vector.shape_cast %113 : vector<32xf32> to vector<32x1xf32>
    %cst_42 = arith.constant 6.400000e+01 : f32
    %115 = vector.broadcast %cst_42 : f32 to vector<32x1xf32>
    %116 = arith.divf %114, %115 : vector<32x1xf32>
    %117 = vector.broadcast %116 : vector<32x1xf32> to vector<32x64xf32>
    %118 = arith.subf %110, %117 : vector<32x64xf32>
    %119 = arith.mulf %118, %118 : vector<32x64xf32>
    %cst_43 = arith.constant dense<0.000000e+00> : vector<32xf32>
    %120 = vector.multi_reduction <add>, %119, %cst_43 [1] : vector<32x64xf32> to vector<32xf32>
    %121 = vector.shape_cast %120 : vector<32xf32> to vector<32x1xf32>
    %cst_44 = arith.constant 6.400000e+01 : f32
    %122 = vector.broadcast %cst_44 : f32 to vector<32x1xf32>
    %123 = arith.divf %121, %122 : vector<32x1xf32>
    %124 = vector.broadcast %116 : vector<32x1xf32> to vector<32x64xf32>
    %125 = arith.subf %110, %124 : vector<32x64xf32>
    %cst_45 = arith.constant 9.99999996E-13 : f32
    %126 = vector.broadcast %cst_45 : f32 to vector<32x1xf32>
    %127 = arith.addf %123, %126 : vector<32x1xf32>
    %128 = math.rsqrt %127 : vector<32x1xf32>
    %129 = vector.broadcast %128 : vector<32x1xf32> to vector<32x64xf32>
    %130 = arith.mulf %125, %129 : vector<32x64xf32>
    %131 = vector.broadcast %111 : vector<1x64xf32> to vector<32x64xf32>
    %132 = arith.mulf %130, %131 : vector<32x64xf32>
    %133 = vector.broadcast %112 : vector<1x64xf32> to vector<32x64xf32>
    %134 = arith.addf %132, %133 : vector<32x64xf32>
    %c0_46 = arith.constant 0 : index
    %c0_47 = arith.constant 0 : index
    %135 = vector.load %arg8[%c0_46, %c0_47] : memref<128x64xf32, #tpu.memory_space<vmem>>, vector<128x64xf32>
    %cst_48 = arith.constant dense<0.000000e+00> : vector<32x128xf32>
    %136 = tpu.matmul %134, %135, %cst_48 {dimension_numbers = #tpu.dot_dimension_numbers<[1], [1], [0], [0], [0, 0, 1, 0], [], []>} : vector<32x64xf32>, vector<128x64xf32>, vector<32x128xf32> -> vector<32x128xf32>
    %c0_49 = arith.constant 0 : index
    %c0_50 = arith.constant 0 : index
    %137 = vector.load %arg9[%c0_49, %c0_50] : memref<1x128xf32, #tpu.memory_space<vmem>>, vector<1x128xf32>
    %138 = vector.broadcast %137 : vector<1x128xf32> to vector<32x128xf32>
    %139 = arith.addf %136, %138 : vector<32x128xf32>
    %140 = arith.mulf %139, %139 : vector<32x128xf32>
    %141 = arith.mulf %139, %140 : vector<32x128xf32>
    %cst_51 = arith.constant 4.471500e-02 : f32
    %142 = vector.broadcast %cst_51 : f32 to vector<32x128xf32>
    %143 = arith.mulf %142, %141 : vector<32x128xf32>
    %144 = arith.addf %139, %143 : vector<32x128xf32>
    %cst_52 = arith.constant 0.797884583 : f32
    %145 = vector.broadcast %cst_52 : f32 to vector<32x128xf32>
    %146 = arith.mulf %145, %144 : vector<32x128xf32>
    %147 = math.tanh %146 : vector<32x128xf32>
    %cst_53 = arith.constant 1.000000e+00 : f32
    %148 = vector.broadcast %cst_53 : f32 to vector<32x128xf32>
    %149 = arith.addf %148, %147 : vector<32x128xf32>
    %cst_54 = arith.constant 5.000000e-01 : f32
    %150 = vector.broadcast %cst_54 : f32 to vector<32x128xf32>
    %151 = arith.mulf %150, %149 : vector<32x128xf32>
    %152 = arith.mulf %139, %151 : vector<32x128xf32>
    %c0_55 = arith.constant 0 : index
    %c0_56 = arith.constant 0 : index
    %153 = vector.load %arg10[%c0_55, %c0_56] : memref<64x128xf32, #tpu.memory_space<vmem>>, vector<64x128xf32>
    %cst_57 = arith.constant dense<0.000000e+00> : vector<32x64xf32>
    %154 = tpu.matmul %152, %153, %cst_57 {dimension_numbers = #tpu.dot_dimension_numbers<[1], [1], [0], [0], [0, 0, 1, 0], [], []>} : vector<32x128xf32>, vector<64x128xf32>, vector<32x64xf32> -> vector<32x64xf32>
    %c0_58 = arith.constant 0 : index
    %c0_59 = arith.constant 0 : index
    %155 = vector.load %arg11[%c0_58, %c0_59] : memref<1x64xf32, #tpu.memory_space<vmem>>, vector<1x64xf32>
    %156 = vector.broadcast %155 : vector<1x64xf32> to vector<32x64xf32>
    %157 = arith.addf %154, %156 : vector<32x64xf32>
    %158 = arith.addf %134, %157 : vector<32x64xf32>
    %c0_60 = arith.constant 0 : index
    %c0_61 = arith.constant 0 : index
    %159 = vector.load %arg12[%c0_60, %c0_61] : memref<1x64xf32, #tpu.memory_space<vmem>>, vector<1x64xf32>
    %c0_62 = arith.constant 0 : index
    %c0_63 = arith.constant 0 : index
    %160 = vector.load %arg13[%c0_62, %c0_63] : memref<1x64xf32, #tpu.memory_space<vmem>>, vector<1x64xf32>
    %cst_64 = arith.constant dense<0.000000e+00> : vector<32xf32>
    %161 = vector.multi_reduction <add>, %158, %cst_64 [1] : vector<32x64xf32> to vector<32xf32>
    %162 = vector.shape_cast %161 : vector<32xf32> to vector<32x1xf32>
    %cst_65 = arith.constant 6.400000e+01 : f32
    %163 = vector.broadcast %cst_65 : f32 to vector<32x1xf32>
    %164 = arith.divf %162, %163 : vector<32x1xf32>
    %165 = vector.broadcast %164 : vector<32x1xf32> to vector<32x64xf32>
    %166 = arith.subf %158, %165 : vector<32x64xf32>
    %167 = arith.mulf %166, %166 : vector<32x64xf32>
    %cst_66 = arith.constant dense<0.000000e+00> : vector<32xf32>
    %168 = vector.multi_reduction <add>, %167, %cst_66 [1] : vector<32x64xf32> to vector<32xf32>
    %169 = vector.shape_cast %168 : vector<32xf32> to vector<32x1xf32>
    %cst_67 = arith.constant 6.400000e+01 : f32
    %170 = vector.broadcast %cst_67 : f32 to vector<32x1xf32>
    %171 = arith.divf %169, %170 : vector<32x1xf32>
    %172 = vector.broadcast %164 : vector<32x1xf32> to vector<32x64xf32>
    %173 = arith.subf %158, %172 : vector<32x64xf32>
    %cst_68 = arith.constant 9.99999996E-13 : f32
    %174 = vector.broadcast %cst_68 : f32 to vector<32x1xf32>
    %175 = arith.addf %171, %174 : vector<32x1xf32>
    %176 = math.rsqrt %175 : vector<32x1xf32>
    %177 = vector.broadcast %176 : vector<32x1xf32> to vector<32x64xf32>
    %178 = arith.mulf %173, %177 : vector<32x64xf32>
    %179 = vector.broadcast %159 : vector<1x64xf32> to vector<32x64xf32>
    %180 = arith.mulf %178, %179 : vector<32x64xf32>
    %181 = vector.broadcast %160 : vector<1x64xf32> to vector<32x64xf32>
    %182 = arith.addf %180, %181 : vector<32x64xf32>
    %c0_69 = arith.constant 0 : index
    %c0_70 = arith.constant 0 : index
    %183 = vector.load %arg14[%c0_69, %c0_70] : memref<32x64xf32, #tpu.memory_space<vmem>>, vector<32x64xf32>
    tpu.vector_store %arg14[%c0_69, %c0_70], %182 {strides = array<i32>} : memref<32x64xf32, #tpu.memory_space<vmem>>, vector<32x64xf32>,
    return
  }
}

module attributes {stable_mosaic.version = 11 : i64} {
  func.func @_law_heads_kernel(%arg0: memref<32x64xf32, #tpu.memory_space<vmem>>, %arg1: memref<2x64xf32, #tpu.memory_space<vmem>>, %arg2: memref<8x64xf32, #tpu.memory_space<vmem>>, %arg3: memref<64x64xf32, #tpu.memory_space<vmem>>, %arg4: memref<1x64xf32, #tpu.memory_space<vmem>>, %arg5: memref<128x64xf32, #tpu.memory_space<vmem>>, %arg6: memref<1x128xf32, #tpu.memory_space<vmem>>, %arg7: memref<1x128xf32, #tpu.memory_space<vmem>>, %arg8: memref<128x8xf32, #tpu.memory_space<vmem>>, %arg9: memref<1x1xf32, #tpu.memory_space<vmem>>, %arg10: memref<2x32xf32, #tpu.memory_space<vmem>>, %arg11: memref<1x1xf32, #tpu.memory_space<vmem>>, %arg12: memref<8x64xf32, #tpu.memory_space<vmem>>, %arg13: memref<1x8xf32, #tpu.memory_space<vmem>>, %arg14: memref<8x8xf32, #tpu.memory_space<vmem>>, %arg15: memref<1x8xf32, #tpu.memory_space<vmem>>, %arg16: memref<8x8xf32, #tpu.memory_space<vmem>>, %arg17: memref<1x8xf32, #tpu.memory_space<vmem>>, %arg18: memref<12x64xf32, #tpu.memory_space<vmem>>, %arg19: memref<1x12xf32, #tpu.memory_space<vmem>>, %arg20: memref<11x64xf32, #tpu.memory_space<vmem>>, %arg21: memref<1x11xf32, #tpu.memory_space<vmem>>, %arg22: memref<2x8xf32, #tpu.memory_space<vmem>>, %arg23: memref<2x12xf32, #tpu.memory_space<vmem>>, %arg24: memref<2x11xf32, #tpu.memory_space<vmem>>, %arg25: memref<8x8xf32, #tpu.memory_space<vmem>>) attributes {dimension_semantics = [], scalar_prefetch = 0 : i64, scratch_operands = 0 : i64, tpu.core_type = #tpu.core_type<tc>} {
    %c0 = arith.constant 0 : index
    %c0_0 = arith.constant 0 : index
    %0 = vector.load %arg0[%c0, %c0_0] : memref<32x64xf32, #tpu.memory_space<vmem>>, vector<32x64xf32>
    %c0_1 = arith.constant 0 : index
    %c0_2 = arith.constant 0 : index
    %1 = vector.load %arg3[%c0_1, %c0_2] : memref<64x64xf32, #tpu.memory_space<vmem>>, vector<64x64xf32>
    %cst = arith.constant dense<0.000000e+00> : vector<32x64xf32>
    %2 = tpu.matmul %0, %1, %cst {dimension_numbers = #tpu.dot_dimension_numbers<[1], [1], [0], [0], [0, 0, 1, 0], [], []>} : vector<32x64xf32>, vector<64x64xf32>, vector<32x64xf32> -> vector<32x64xf32>
    %c0_3 = arith.constant 0 : index
    %c0_4 = arith.constant 0 : index
    %3 = vector.load %arg4[%c0_3, %c0_4] : memref<1x64xf32, #tpu.memory_space<vmem>>, vector<1x64xf32>
    %4 = vector.broadcast %3 : vector<1x64xf32> to vector<32x64xf32>
    %5 = arith.addf %2, %4 : vector<32x64xf32>
    %c0_5 = arith.constant 0 : index
    %c0_6 = arith.constant 0 : index
    %6 = vector.load %arg5[%c0_5, %c0_6] : memref<128x64xf32, #tpu.memory_space<vmem>>, vector<128x64xf32>
    %cst_7 = arith.constant dense<0.000000e+00> : vector<32x128xf32>
    %7 = tpu.matmul %5, %6, %cst_7 {dimension_numbers = #tpu.dot_dimension_numbers<[1], [1], [0], [0], [0, 0, 1, 0], [], []>} : vector<32x64xf32>, vector<128x64xf32>, vector<32x128xf32> -> vector<32x128xf32>
    %cst_8 = arith.constant 1.250000e-01 : f32
    %8 = vector.broadcast %cst_8 : f32 to vector<32x128xf32>
    %9 = arith.mulf %7, %8 : vector<32x128xf32>
    %c0_9 = arith.constant 0 : index
    %c0_10 = arith.constant 0 : index
    %10 = vector.load %arg6[%c0_9, %c0_10] : memref<1x128xf32, #tpu.memory_space<vmem>>, vector<1x128xf32>
    %11 = vector.broadcast %10 : vector<1x128xf32> to vector<32x128xf32>
    %12 = arith.addf %9, %11 : vector<32x128xf32>
    %cst_11 = arith.constant dense<0xFF800000> : vector<32xf32>
    %13 = vector.multi_reduction <maximumf>, %12, %cst_11 [1] : vector<32x128xf32> to vector<32xf32>
    %14 = vector.shape_cast %13 : vector<32xf32> to vector<32x1xf32>
    %15 = vector.broadcast %14 : vector<32x1xf32> to vector<32x128xf32>
    %16 = arith.subf %12, %15 : vector<32x128xf32>
    %17 = math.exp %16 : vector<32x128xf32>
    %c0_12 = arith.constant 0 : index
    %c0_13 = arith.constant 0 : index
    %18 = vector.load %arg8[%c0_12, %c0_13] : memref<128x8xf32, #tpu.memory_space<vmem>>, vector<128x8xf32>
    %cst_14 = arith.constant dense<0.000000e+00> : vector<32x8xf32>
    %19 = tpu.matmul %17, %18, %cst_14 {dimension_numbers = #tpu.dot_dimension_numbers<[1], [0], [0], [1], [0, 0, 1, 1], [], []>} : vector<32x128xf32>, vector<128x8xf32>, vector<32x8xf32> -> vector<32x8xf32>
    %c0_15 = arith.constant 0 : index
    %c0_16 = arith.constant 0 : index
    %20 = vector.load %arg7[%c0_15, %c0_16] : memref<1x128xf32, #tpu.memory_space<vmem>>, vector<1x128xf32>
    %21 = vector.broadcast %20 : vector<1x128xf32> to vector<32x128xf32>
    %22 = arith.mulf %17, %21 : vector<32x128xf32>
    %cst_17 = arith.constant dense<0.000000e+00> : vector<32x8xf32>
    %23 = tpu.matmul %22, %18, %cst_17 {dimension_numbers = #tpu.dot_dimension_numbers<[1], [0], [0], [1], [0, 0, 1, 1], [], []>} : vector<32x128xf32>, vector<128x8xf32>, vector<32x8xf32> -> vector<32x8xf32>
    %24 = tpu.reciprocal %19 {approx = true} : vector<32x8xf32> -> vector<32x8xf32>
    %25 = arith.mulf %23, %24 : vector<32x8xf32>
    %c0_18 = arith.constant 0 : index
    %c0_19 = arith.constant 0 : index
    %26 = vector.load %arg9[%c0_18, %c0_19] : memref<1x1xf32, #tpu.memory_space<vmem>>, vector<1x1xf32>
    %27 = vector.broadcast %26 : vector<1x1xf32> to vector<32x8xf32>
    %28 = arith.addf %25, %27 : vector<32x8xf32>
    %c0_20 = arith.constant 0 : index
    %c0_21 = arith.constant 0 : index
    %29 = vector.load %arg10[%c0_20, %c0_21] : memref<2x32xf32, #tpu.memory_space<vmem>>, vector<2x32xf32>
    %cst_22 = arith.constant dense<0.000000e+00> : vector<2x8xf32>
    %30 = tpu.matmul %29, %28, %cst_22 {dimension_numbers = #tpu.dot_dimension_numbers<[1], [0], [0], [1], [0, 0, 1, 1], [], []>} : vector<2x32xf32>, vector<32x8xf32>, vector<2x8xf32> -> vector<2x8xf32>
    %c0_23 = arith.constant 0 : index
    %c0_24 = arith.constant 0 : index
    %31 = vector.load %arg11[%c0_23, %c0_24] : memref<1x1xf32, #tpu.memory_space<vmem>>, vector<1x1xf32>
    %32 = vector.broadcast %31 : vector<1x1xf32> to vector<2x8xf32>
    %33 = arith.addf %30, %32 : vector<2x8xf32>
    %c0_25 = arith.constant 0 : index
    %c0_26 = arith.constant 0 : index
    %34 = vector.load %arg1[%c0_25, %c0_26] : memref<2x64xf32, #tpu.memory_space<vmem>>, vector<2x64xf32>
    %c0_27 = arith.constant 0 : index
    %c0_28 = arith.constant 0 : index
    %35 = vector.load %arg12[%c0_27, %c0_28] : memref<8x64xf32, #tpu.memory_space<vmem>>, vector<8x64xf32>
    %cst_29 = arith.constant dense<0.000000e+00> : vector<2x8xf32>
    %36 = tpu.matmul %34, %35, %cst_29 {dimension_numbers = #tpu.dot_dimension_numbers<[1], [1], [0], [0], [0, 0, 1, 0], [], []>} : vector<2x64xf32>, vector<8x64xf32>, vector<2x8xf32> -> vector<2x8xf32>
    %c0_30 = arith.constant 0 : index
    %c0_31 = arith.constant 0 : index
    %37 = vector.load %arg13[%c0_30, %c0_31] : memref<1x8xf32, #tpu.memory_space<vmem>>, vector<1x8xf32>
    %38 = vector.broadcast %37 : vector<1x8xf32> to vector<2x8xf32>
    %39 = arith.addf %36, %38 : vector<2x8xf32>
    %c0_32 = arith.constant 0 : index
    %c0_33 = arith.constant 0 : index
    %40 = vector.load %arg14[%c0_32, %c0_33] : memref<8x8xf32, #tpu.memory_space<vmem>>, vector<8x8xf32>
    %cst_34 = arith.constant dense<0.000000e+00> : vector<2x8xf32>
    %41 = tpu.matmul %39, %40, %cst_34 {dimension_numbers = #tpu.dot_dimension_numbers<[1], [1], [0], [0], [0, 0, 1, 0], [], []>} : vector<2x8xf32>, vector<8x8xf32>, vector<2x8xf32> -> vector<2x8xf32>
    %c0_35 = arith.constant 0 : index
    %c0_36 = arith.constant 0 : index
    %42 = vector.load %arg15[%c0_35, %c0_36] : memref<1x8xf32, #tpu.memory_space<vmem>>, vector<1x8xf32>
    %43 = vector.broadcast %42 : vector<1x8xf32> to vector<2x8xf32>
    %44 = arith.addf %41, %43 : vector<2x8xf32>
    %c0_37 = arith.constant 0 : index
    %c0_38 = arith.constant 0 : index
    %45 = vector.load %arg16[%c0_37, %c0_38] : memref<8x8xf32, #tpu.memory_space<vmem>>, vector<8x8xf32>
    %cst_39 = arith.constant dense<0.000000e+00> : vector<2x8xf32>
    %46 = tpu.matmul %33, %45, %cst_39 {dimension_numbers = #tpu.dot_dimension_numbers<[1], [1], [0], [0], [0, 0, 1, 0], [], []>} : vector<2x8xf32>, vector<8x8xf32>, vector<2x8xf32> -> vector<2x8xf32>
    %47 = arith.addf %44, %46 : vector<2x8xf32>
    %c0_40 = arith.constant 0 : index
    %c0_41 = arith.constant 0 : index
    %48 = vector.load %arg17[%c0_40, %c0_41] : memref<1x8xf32, #tpu.memory_space<vmem>>, vector<1x8xf32>
    %49 = vector.broadcast %48 : vector<1x8xf32> to vector<2x8xf32>
    %50 = arith.addf %47, %49 : vector<2x8xf32>
    %c0_42 = arith.constant 0 : index
    %c0_43 = arith.constant 0 : index
    %51 = vector.load %arg22[%c0_42, %c0_43] : memref<2x8xf32, #tpu.memory_space<vmem>>, vector<2x8xf32>
    tpu.vector_store %arg22[%c0_42, %c0_43], %50 {strides = array<i32>} : memref<2x8xf32, #tpu.memory_space<vmem>>, vector<2x8xf32>,
    %c0_44 = arith.constant 0 : index
    %c0_45 = arith.constant 0 : index
    %52 = vector.load %arg18[%c0_44, %c0_45] : memref<12x64xf32, #tpu.memory_space<vmem>>, vector<12x64xf32>
    %cst_46 = arith.constant dense<0.000000e+00> : vector<2x12xf32>
    %53 = tpu.matmul %34, %52, %cst_46 {dimension_numbers = #tpu.dot_dimension_numbers<[1], [1], [0], [0], [0, 0, 1, 0], [], []>} : vector<2x64xf32>, vector<12x64xf32>, vector<2x12xf32> -> vector<2x12xf32>
    %c0_47 = arith.constant 0 : index
    %c0_48 = arith.constant 0 : index
    %54 = vector.load %arg19[%c0_47, %c0_48] : memref<1x12xf32, #tpu.memory_space<vmem>>, vector<1x12xf32>
    %55 = vector.broadcast %54 : vector<1x12xf32> to vector<2x12xf32>
    %56 = arith.addf %53, %55 : vector<2x12xf32>
    %c0_49 = arith.constant 0 : index
    %c0_50 = arith.constant 0 : index
    %57 = vector.load %arg23[%c0_49, %c0_50] : memref<2x12xf32, #tpu.memory_space<vmem>>, vector<2x12xf32>
    tpu.vector_store %arg23[%c0_49, %c0_50], %56 {strides = array<i32>} : memref<2x12xf32, #tpu.memory_space<vmem>>, vector<2x12xf32>,
    %c0_51 = arith.constant 0 : index
    %c0_52 = arith.constant 0 : index
    %58 = vector.load %arg20[%c0_51, %c0_52] : memref<11x64xf32, #tpu.memory_space<vmem>>, vector<11x64xf32>
    %cst_53 = arith.constant dense<0.000000e+00> : vector<2x11xf32>
    %59 = tpu.matmul %34, %58, %cst_53 {dimension_numbers = #tpu.dot_dimension_numbers<[1], [1], [0], [0], [0, 0, 1, 0], [], []>} : vector<2x64xf32>, vector<11x64xf32>, vector<2x11xf32> -> vector<2x11xf32>
    %c0_54 = arith.constant 0 : index
    %c0_55 = arith.constant 0 : index
    %60 = vector.load %arg21[%c0_54, %c0_55] : memref<1x11xf32, #tpu.memory_space<vmem>>, vector<1x11xf32>
    %61 = vector.broadcast %60 : vector<1x11xf32> to vector<2x11xf32>
    %62 = arith.addf %59, %61 : vector<2x11xf32>
    %c0_56 = arith.constant 0 : index
    %c0_57 = arith.constant 0 : index
    %63 = vector.load %arg24[%c0_56, %c0_57] : memref<2x11xf32, #tpu.memory_space<vmem>>, vector<2x11xf32>
    tpu.vector_store %arg24[%c0_56, %c0_57], %62 {strides = array<i32>} : memref<2x11xf32, #tpu.memory_space<vmem>>, vector<2x11xf32>,
    %c0_58 = arith.constant 0 : index
    %c0_59 = arith.constant 0 : index
    %64 = vector.load %arg2[%c0_58, %c0_59] : memref<8x64xf32, #tpu.memory_space<vmem>>, vector<8x64xf32>
    %c0_60 = arith.constant 0 : index
    %c0_61 = arith.constant 0 : index
    %65 = vector.load %arg12[%c0_60, %c0_61] : memref<8x64xf32, #tpu.memory_space<vmem>>, vector<8x64xf32>
    %cst_62 = arith.constant dense<0.000000e+00> : vector<8x8xf32>
    %66 = tpu.matmul %64, %65, %cst_62 {dimension_numbers = #tpu.dot_dimension_numbers<[1], [1], [0], [0], [0, 0, 1, 0], [], []>} : vector<8x64xf32>, vector<8x64xf32>, vector<8x8xf32> -> vector<8x8xf32>
    %c0_63 = arith.constant 0 : index
    %c0_64 = arith.constant 0 : index
    %67 = vector.load %arg13[%c0_63, %c0_64] : memref<1x8xf32, #tpu.memory_space<vmem>>, vector<1x8xf32>
    %68 = vector.broadcast %67 : vector<1x8xf32> to vector<8x8xf32>
    %69 = arith.addf %66, %68 : vector<8x8xf32>
    %c0_65 = arith.constant 0 : index
    %c0_66 = arith.constant 0 : index
    %70 = vector.load %arg25[%c0_65, %c0_66] : memref<8x8xf32, #tpu.memory_space<vmem>>, vector<8x8xf32>
    tpu.vector_store %arg25[%c0_65, %c0_66], %69 {strides = array<i32>} : memref<8x8xf32, #tpu.memory_space<vmem>>, vector<8x8xf32>,
    return
  }
}

</mosaic_0001>

<bundles_post_ra>
// kernel: forward.3
= control target key start
LH: loop header
LB: loop body
LE: loop exit
PB: predicated region body
PF: predicated region fallthrough
CT: control target
= control target key end

     0   :  { %s1191_s0 = inlined_call_operand.vmem [shape: f32[32,64], index: 0, kind: input, shape index: {}]   ;;  %s1192_s1 = inlined_call_operand.vmem [shape: f32[2,64], index: 1, kind: input, shape index: {}]   ;;  %s1193_s2 = inlined_call_operand.vmem [shape: f32[8,64], index: 2, kind: input, shape index: {}]   ;;  %s1194_s3 = inlined_call_operand.vmem [shape: f32[64,64], index: 3, kind: input, shape index: {}]   ;;  %s1195_s4 = inlined_call_operand.vmem [shape: f32[1,64], index: 4, kind: input, shape index: {}]   ;;  %s1196_s5 = inlined_call_operand.vmem [shape: f32[128,64], index: 5, kind: input, shape index: {}]   ;;  %s1197_s6 = inlined_call_operand.vmem [shape: f32[1,128], index: 6, kind: input, shape index: {}]   ;;  %s1198_s7 = inlined_call_operand.vmem [shape: f32[1,128], index: 7, kind: input, shape index: {}]   ;;  %s1199_s8 = inlined_call_operand.vmem [shape: f32[128,8], index: 8, kind: input, shape index: {}]   ;;  %s1200_s9 = inlined_call_operand.<no memory space> [shape: f32[1,1], index: 9, kind: input, shape index: {}]   ;;  %s1201_s10 = inlined_call_operand.vmem [shape: f32[2,32], index: 10, kind: input, shape index: {}]   ;;  %s1202_s12 = inlined_call_operand.vmem [shape: f32[8,64], index: 12, kind: input, shape index: {}]   ;;  %s1203_s13 = inlined_call_operand.vmem [shape: f32[1,8], index: 13, kind: input, shape index: {}]   ;;  %s1204_s14 = inlined_call_operand.vmem [shape: f32[8,8], index: 14, kind: input, shape index: {}]   ;;  %s1205_s15 = inlined_call_operand.vmem [shape: f32[1,8], index: 15, kind: input, shape index: {}]   ;;  %s1206_s16 = inlined_call_operand.vmem [shape: f32[8,8], index: 16, kind: input, shape index: {}]   ;;  %s1207_s17 = inlined_call_operand.vmem [shape: f32[1,8], index: 17, kind: input, shape index: {}]   ;;  %s1208_s18 = inlined_call_operand.vmem [shape: f32[12,64], index: 18, kind: input, shape index: {}]   ;;  %s1209_s19 = inlined_call_operand.vmem [shape: f32[1,12], index: 19, kind: input, shape index: {}]   ;;  %s1210_s20 = inlined_call_operand.vmem [shape: f32[11,64], index: 20, kind: input, shape index: {}]   ;;  %s1211_s21 = inlined_call_operand.vmem [shape: f32[1,11], index: 21, kind: input, shape index: {}]   ;;  %s1212_s22 = inlined_call_operand.vmem [shape: f32[2,8], index: 22, kind: output, shape index: {0}]   ;;  %s1213_s23 = inlined_call_operand.hbm [shape: f32[2,12], index: 23, kind: output, shape index: {1}]   ;;  %s1214_s24 = inlined_call_operand.hbm [shape: f32[2,11], index: 24, kind: output, shape index: {2}]   ;;  %s1215_s25 = inlined_call_operand.vmem [shape: f32[8,8], index: 25, kind: output, shape index: {3}]   ;;  %s1216_s11 = inlined_call_operand.<no memory space> [shape: f32[1,1], index: 11, kind: input, shape index: {}]  }
   0x1   :  { %1221 = sst [smem:[#allocation10_spill]] %s1191_s0  ;;  %v33_v1 = vstv %s1216_s11 }
   0x2   :  { %1222 = sst [smem:[#allocation11_spill]] %s1192_s1  ;;  %34 = vst [vmem:[#allocation3] sm:$0x1] %v33_v1 }
   0x3   :  { %1223 = sst [smem:[#allocation12_spill]] %s1193_s2 }
   0x4   :  { %1224 = sst [smem:[#allocation13_spill]] %s1194_s3 }
   0x5   :  { %1225 = sst [smem:[#allocation14_spill]] %s1195_s4 }
   0x6   :  { %1226 = sst [smem:[#allocation15_spill]] %s1196_s5 }
   0x7   :  { %1227 = sst [smem:[#allocation16_spill]] %s1197_s6 }
   0x8   :  { %1228 = sst [smem:[#allocation17_spill]] %s1198_s7 }
   0x9   :  { %1229 = sst [smem:[#allocation18_spill]] %s1199_s8 }
   0xa   :  { %1230 = sst [smem:[#allocation19_spill]] %s1200_s9 }
   0xb   :  { %s1231_s6 = sld [smem:[#allocation19_spill]] }
  0x11   :  { %v31_v0 = vstv %s1231_s6 }
  0x12   :  { %32 = vst [vmem:[#allocation2] sm:$0x1] %v31_v0 }
  0x13   :  { %35 = vsyncpa [#allocation5], 0  ;;  %s1232_s1 = sld [smem:[#allocation13_spill]]  ;;  %vm97_vm0 = vcmask 523264  }
  0x19   :  { %v92_v2 = vld [vmem:[%s1232_s1 + $0x38] sm:$0xff]  ;;  %v91_v3 = vld [vmem:[%s1232_s1 + $0x30] sm:$0xff]  ;;  %v90_v4 = vld [vmem:[%s1232_s1 + $0x28] sm:$0xff] }
  0x1a   :  { %673 = vmatpush.xpose.msk.msra.mxu0 %vm97_vm0, %v92_v2 }
  0x1e   :  { %674 = vmatpush.xpose.msk.msra.mxu0 %vm97_vm0, %v91_v3 }
  0x1f   :  { %36 = vsyncpa [#allocation7], 0  ;;  %v89_v5 = vld [vmem:[%s1232_s1 + $0x20] sm:$0xff]  ;;  %v88_v6 = vld [vmem:[%s1232_s1 + $0x18] sm:$0xff]  ;;  %s1233_s26 = sld [smem:[#allocation15_spill]]  ;;  %vm470_vm1 = vcmask 64512  }
  0x20   :  { %v87_v7 = vld [vmem:[%s1232_s1 + $0x10] sm:$0xff]  ;;  %v86_v8 = vld [vmem:[%s1232_s1 + $0x8] sm:$0xff]  ;;  %v85_v10 = vld [vmem:[%s1232_s1] sm:$0xff]  ;;  %s1234_s5 = sld [smem:[#allocation10_spill]]  ;;  %vm409_vm2 = vcmask 261120   ;;  %s805_s7 = smov [#allocation6]  }
  0x21   :  { %s1235_s3 = sld [smem:[#allocation14_spill]]  ;;  %s806_s8 = smov [#allocation4]   ;;  %vm598_vm3 = vcmask 82944   ;;  %vm564_vm4 = vcmask 91136   ;;  %vm530_vm5 = vcmask 58368  }
  0x22   :  { %675 = vmatpush.xpose.msk.msra.mxu0 %vm97_vm0, %v90_v4  ;;  %s1236_s27 = sld [smem:[#allocation18_spill]] }
  0x23   :  { %s1237_s9 = sld [smem:[#allocation16_spill]] }
  0x24   :  { %s1238_s0 = sld [smem:[#allocation17_spill]] }
  0x25   :  { %v178_v9 = vld [vmem:[%s1233_s26 + $0x78] sm:$0xff]  ;;  %v177_v11 = vld [vmem:[%s1233_s26 + $0x70] sm:$0xff]  ;;  %v176_v13 = vld [vmem:[%s1233_s26 + $0x68] sm:$0xff]  ;;  %s1239_s6 = sld [smem:[#allocation11_spill]] }
  0x26   :  { %676 = vmatpush.xpose.msk.msra.mxu0 %vm97_vm0, %v89_v5  ;;  %685 = vmatpush.xpose.msk.msra.mxu1 %vm97_vm0, %v178_v9  ;;  %v81_v12 = vld [vmem:[%s1234_s5] sm:$0xff]  ;;  %v82_v15 = vld [vmem:[%s1234_s5 + $0x8] sm:$0xff]  ;;  %v174_v16 = vld [vmem:[%s1233_s26 + $0x58] sm:$0xff]  ;;  %s1240_s1 = sld [smem:[#allocation12_spill]] }
  0x27   :  { %v175_v14 = vld [vmem:[%s1233_s26 + $0x60] sm:$0xff]  ;;  %v173_v17 = vld [vmem:[%s1233_s26 + $0x50] sm:$0xff]  ;;  %v172_v19 = vld [vmem:[%s1233_s26 + $0x48] sm:$0xff] }
  0x28   :  { %v83_v18 = vld [vmem:[%s1234_s5 + $0x10] sm:$0xff]  ;;  %v171_v20 = vld [vmem:[%s1233_s26 + $0x40] sm:$0xff]  ;;  %v84_v21 = vld [vmem:[%s1234_s5 + $0x18] sm:$0xff]  ;;  %s640_s5 = sshll.u32 %s806_s8, 4  ;;  %s641_s5 = int_to_ptr.vmem [resolvable:$true] %s640_s5 }
  0x29   :  { %v170_v22 = vld [vmem:[%s1233_s26 + $0x38] sm:$0xff]  ;;  %v169_v23 = vld [vmem:[%s1233_s26 + $0x30] sm:$0xff]  ;;  %v168_v24 = vld [vmem:[%s1233_s26 + $0x28] sm:$0xff] }
  0x2a   :  { %677 = vmatpush.xpose.msk.msra.mxu0 %vm97_vm0, %v88_v6  ;;  %686 = vmatpush.xpose.msk.msra.mxu1 %vm97_vm0, %v177_v11  ;;  %v167_v25 = vld [vmem:[%s1233_s26 + $0x20] sm:$0xff]  ;;  %v166_v26 = vld [vmem:[%s1233_s26 + $0x18] sm:$0xff]  ;;  %v165_v27 = vld [vmem:[%s1233_s26 + $0x10] sm:$0xff] }
  0x2b   :  { %v164_v28 = vld [vmem:[%s1233_s26 + $0x8] sm:$0xff]  ;;  %v163_v29 = vld [vmem:[%s1233_s26] sm:$0xff]  ;;  %v315_v39 = vld [vmem:[%s1236_s27 + $0x78] sm:$0xff]  ;;  %s653_s26 = sshll.u32 %s1214_s24, 4  ;;  %s654_s26 = int_to_ptr.hbm [resolvable:$true] %s653_s26 }
  0x2c   :  { %v725_v30 = vld [vmem:[%s1235_s3] ss:$0 sm:$0xff]  ;;  %v314_v40 = vld [vmem:[%s1236_s27 + $0x70] sm:$0xff]  ;;  %316 = vmatpush.msra.mxu2 %v315_v39  ;;  %353 = vmatpush.msra.mxu3 %v315_v39  ;;  %v313_v42 = vld [vmem:[%s1236_s27 + $0x68] sm:$0xff] }
  0x2d   :  { %v726_v41 = vld [vmem:[%s1237_s9] ss:$0 sm:$0xff]  ;;  %v311_v47 = vld [vmem:[%s1236_s27 + $0x58] sm:$0xff]  ;;  %v310_v48 = vld [vmem:[%s1236_s27 + $0x50] sm:$0xff] }
  0x2e   :  { %678 = vmatpush.xpose.msk.msra.mxu0 %vm97_vm0, %v87_v7  ;;  %687 = vmatpush.xpose.msk.msra.mxu1 %vm97_vm0, %v176_v13  ;;  %v312_v45 = vld [vmem:[%s1236_s27 + $0x60] sm:$0xff]  ;;  %v309_v49 = vld [vmem:[%s1236_s27 + $0x48] sm:$0xff]  ;;  %v307_v54 = vld [vmem:[%s1236_s27 + $0x38] sm:$0xff] }
  0x2f   :  { %317 = vmatpush.msra.mxu2 %v314_v40  ;;  %354 = vmatpush.msra.mxu3 %v314_v40  ;;  %v308_v52 = vld [vmem:[%s1236_s27 + $0x40] sm:$0xff]  ;;  %v306_v55 = vld [vmem:[%s1236_s27 + $0x30] sm:$0xff]  ;;  %v305_v62 = vld [vmem:[%s1236_s27 + $0x28] sm:$0xff] }
  0x30   :  { %v304_v63 = vld [vmem:[%s1236_s27 + $0x20] sm:$0xff]  ;;  %v303_v0 = vld [vmem:[%s1236_s27 + $0x18] sm:$0xff]  ;;  %v302_v1 = vld [vmem:[%s1236_s27 + $0x10] sm:$0xff] }
  0x31   :  { %318 = vmatpush.msra.mxu2 %v313_v42  ;;  %355 = vmatpush.msra.mxu3 %v313_v42  ;;  %v301_v2 = vld [vmem:[%s1236_s27 + $0x8] sm:$0xff]  ;;  %v300_v3 = vld [vmem:[%s1236_s27] sm:$0xff] }
  0x32   :  { %679 = vmatpush.xpose.msk.msra.mxu0 %vm97_vm0, %v86_v8  ;;  %688 = vmatpush.xpose.msk.msra.mxu1 %vm97_vm0, %v175_v14  ;;  %v728_v7 = vld [vmem:[#allocation2] ss:$0 sm:$0xff]  ;;  %v804_v8 = vmov 0  }
  0x33   :  { %319 = vmatpush.msra.mxu2 %v312_v45  ;;  %356 = vmatpush.msra.mxu3 %v312_v45 }
  0x34   :  { %723 = vset.pattern.permute.xlu2 %v804_v8  ;;  %724 = vset.pattern.permute.xlu0 %v804_v8  ;;  %v731_v8 = vld [vmem:[%s1205_s15] ss:$0 sm:$0xff] }
  0x35   :  { %320 = vmatpush.msra.mxu2 %v311_v47  ;;  %357 = vmatpush.msra.mxu3 %v311_v47 }
  0x36   :  { %680 = vmatpush.xpose.msk.msra.mxu0 %vm97_vm0, %v85_v10  ;;  %689 = vmatpush.xpose.msk.msra.mxu1 %vm97_vm0, %v174_v16  ;;  %v727_v10 = vld [vmem:[%s1238_s0] ss:$0 sm:$0xff] }
  0x37   :  { %321 = vmatpush.msra.mxu2 %v310_v48  ;;  %358 = vmatpush.msra.mxu3 %v310_v48 }
  0x38   :  { %394 = vperm.xlu2 %723, %v728_v7  }
  0x39   :  { %681 = vmatmul.msk.f32.vlgmr.msra.gmra.mxu0 %vm97_vm0, %v81_v12  ;;  %322 = vmatpush.msra.mxu2 %v309_v49 }
  0x3a   :  { %690 = vmatpush.xpose.msk.msra.mxu1 %vm97_vm0, %v173_v17  ;;  %359 = vmatpush.msra.mxu3 %v309_v49 }
  0x3b   :  { %323 = vmatpush.msra.mxu2 %v308_v52 }
  0x3c   :  { %360 = vmatpush.msra.mxu3 %v308_v52  ;;  %v401_v52 = vld [vmem:[%s1201_s10] sm:$0x3]  ;;  %s642_s10 = sshll.u32 %s1213_s23, 4  ;;  %s643_s10 = int_to_ptr.hbm [resolvable:$true] %s642_s10 }
  0x3d   :  { %324 = vmatpush.msra.mxu2 %v307_v54 }
  0x3e   :  { %691 = vmatpush.xpose.msk.msra.mxu1 %vm97_vm0, %v172_v19  ;;  %361 = vmatpush.msra.mxu3 %v307_v54 }
  0x3f   :  { %325 = vmatpush.msra.mxu2 %v306_v55 }
  0x40   :  { %362 = vmatpush.msra.mxu3 %v306_v55 }
  0x41   :  { %682 = vmatmul.msk.f32.gmra.mxu0 %vm97_vm0, %v82_v15  ;;  %326 = vmatpush.msra.mxu2 %v305_v62  ;;  %v729_v15 = vld [vmem:[#allocation3] ss:$0 sm:$0xff] }
  0x42   :  { %692 = vmatpush.xpose.msk.msra.mxu1 %vm97_vm0, %v171_v20  ;;  %363 = vmatpush.msra.mxu3 %v305_v62 }
  0x43   :  { %327 = vmatpush.msra.mxu2 %v304_v63  ;;  %406 = vperm.xlu2 %723, %v729_v15  }
  0x44   :  { %364 = vmatpush.msra.mxu3 %v304_v63 }
  0x45   :  { %328 = vmatpush.msra.mxu2 %v303_v0 }
  0x46   :  { %693 = vmatpush.xpose.msk.msra.mxu1 %vm97_vm0, %v170_v22  ;;  %365 = vmatpush.msra.mxu3 %v303_v0  ;;  %v600_v0 = vld [vmem:[%s1240_s1] sm:$0xff] }
  0x47   :  { %329 = vmatpush.msra.mxu2 %v302_v1 }
  0x48   :  { %366 = vmatpush.msra.mxu3 %v302_v1 }
  0x49   :  { %683 = vmatmul.msk.f32.gmra.mxu0 %vm97_vm0, %v83_v18  ;;  %330 = vmatpush.msra.mxu2 %v301_v2 }
  0x4a   :  { %694 = vmatpush.xpose.msk.msra.mxu1 %vm97_vm0, %v169_v23  ;;  %367 = vmatpush.msra.mxu3 %v301_v2  ;;  %v733_v2 = vld [vmem:[%s1209_s19] ss:$0 sm:$0xff] }
  0x4b   :  { %331 = vmatpush.msra.mxu2 %v300_v3 }
  0x4c   :  { %368 = vmatpush.msra.mxu3 %v300_v3  ;;  %v734_v3 = vld [vmem:[%s1211_s21] ss:$0 sm:$0xff] }
  0x4e   :  { %695 = vmatpush.xpose.msk.msra.mxu1 %vm97_vm0, %v168_v24 }
  0x51   :  { %684 = vmatmul.msk.f32.gmra.mxu0 %vm97_vm0, %v84_v21 }
  0x52   :  { %696 = vmatpush.xpose.msk.msra.mxu1 %vm97_vm0, %v167_v25 }
  0x56   :  { %697 = vmatpush.xpose.msk.msra.mxu1 %vm97_vm0, %v166_v26 }
  0x5a   :  { %698 = vmatpush.xpose.msk.msra.mxu1 %vm97_vm0, %v165_v27 }
  0x5e   :  { %699 = vmatpush.xpose.msk.msra.mxu1 %vm97_vm0, %v164_v28  ;;  %v434_v28 = vld [vmem:[%s1202_s12] sm:$0xff]  ;;  %s651_s12 = sshll.u32 %s805_s7, 4  ;;  %s652_s12 = int_to_ptr.vmem [resolvable:$true] %s651_s12 }
  0x5f   :  { %706 = vmatpush.xpose.msk.msrb.mxu2 %vm97_vm0, %v434_v28 }
  0x62   :  { %700 = vmatpush.xpose.msk.msra.mxu1 %vm97_vm0, %v163_v29  ;;  %v433_v29 = vld [vmem:[%s1239_s6] sm:$0x3] }
  0x92   :  { %v395_v45 = vpop.permute.xlu2 %394 }
  0xb6   :  { %v151_v31 = vpop.f32.mrf.mxu0 }
  0xb7   :  { %v152_v32 = vadd.f32 %v725_v30, %v151_v31 }
  0xb9   :  { %701 = vmatmul.msk.f32.vlgmr.msra.gmra.mxu1 %vm97_vm0, %v152_v32 }
  0xbe   :  { %v154_v33 = vpop.f32.mrf.mxu0 }
  0xbf   :  { %v155_v34 = vadd.f32 %v725_v30, %v154_v33 }
  0xc1   :  { %702 = vmatmul.msk.f32.gmra.mxu1 %vm97_vm0, %v155_v34  ;;  %v465_v34 = vld [vmem:[%s1204_s14] sm:$0xff] }
  0xc2   :  { %708 = vmatpush.xpose.msk.msrb.mxu3 %vm470_vm1, %v465_v34 }
  0xc6   :  { %v157_v35 = vpop.f32.mrf.mxu0 }
  0xc7   :  { %v158_v36 = vadd.f32 %v725_v30, %v157_v35 }
  0xc9   :  { %703 = vmatmul.msk.f32.gmra.mxu1 %vm97_vm0, %v158_v36 }
  0xce   :  { %v160_v37 = vpop.f32.mrf.mxu0 }
  0xcf   :  { %v161_v38 = vadd.f32 %v725_v30, %v160_v37 }
  0xd1   :  { %704 = vmatmul.msk.f32.gmra.mxu1 %vm97_vm0, %v161_v38 }
 0x136   :  { %v256_v43 = vpop.f32.mrf.mxu1 }
 0x137   :  { %v268_v44 = vmul.f32 0.125, %v256_v43 }
 0x139   :  { %v276_v46 = vadd.f32 %v726_v41, %v268_v44 }
 0x13b   :  { %280 = vmax.xlane.f32.xlu0 %v276_v46 }
 0x13e   :  { %v259_v50 = vpop.f32.mrf.mxu1 }
 0x13f   :  { %v269_v51 = vmul.f32 0.125, %v259_v50 }
 0x141   :  { %v277_v53 = vadd.f32 %v726_v41, %v269_v51 }
 0x143   :  { %282 = vmax.xlane.f32.xlu0 %v277_v53 }
 0x146   :  { %v262_v56 = vpop.f32.mrf.mxu1 }
 0x147   :  { %v270_v57 = vmul.f32 0.125, %v262_v56  ;;  %v533_v56 = vld [vmem:[%s1208_s18 + $0x8] sm:$0xf] }
 0x149   :  { %v278_v58 = vadd.f32 %v726_v41, %v270_v57  ;;  %v567_v57 = vld [vmem:[%s1210_s20 + $0x8] sm:$0x7] }
 0x14b   :  { %284 = vmax.xlane.f32.xlu1 %v278_v58 }
 0x14e   :  { %v265_v59 = vpop.f32.mrf.mxu1 }
 0x14f   :  { %v271_v60 = vmul.f32 0.125, %v265_v59  ;;  %v532_v59 = vld [vmem:[%s1208_s18] sm:$0xff] }
 0x151   :  { %v279_v61 = vadd.f32 %v726_v41, %v271_v60  ;;  %v566_v60 = vld [vmem:[%s1210_s20] sm:$0xff] }
 0x153   :  { %286 = vmax.xlane.f32.xlu1 %v279_v61 }
 0x1ae   :  { %v281_v4 = vpop.xlane.xlu0 %280 }
 0x1af   :  { %v288_v5 = vsub.f32 %v276_v46, %v281_v4 }
 0x1b1   :  { %v292_v6 = vmul.f32 1.442695, %v288_v5 }
 0x1b3   :  { %736 = vpow2.f32 %v292_v6 }
 0x1b6   :  { %v283_v9 = vpop.xlane.xlu0 %282 }
 0x1b7   :  { %v289_v11 = vsub.f32 %v277_v53, %v283_v9  ;;  %v730_v53 = vld [vmem:[%s1203_s13] ss:$0 sm:$0xff] }
 0x1b9   :  { %v737_v12 = vpop.eup %736  ;;  %v294_v13 = vmul.f32 1.442695, %v289_v11 }
 0x1ba   :  { %332 = vmatmul.f32.vlgmr.msra.gmra.mxu2 %v737_v12  ;;  %v349_v14 = vmul.f32 %v737_v12, %v727_v10 }
 0x1bb   :  { %738 = vpow2.f32 %v294_v13  ;;  %712 = vmatpush.xpose.msk.msra.mxu2 %vm97_vm0, %v533_v56 }
 0x1bc   :  { %369 = vmatmul.f32.vlgmr.msra.gmra.mxu3 %v349_v14  ;;  %v735_v14 = vld [vmem:[%s1203_s13] ss:$0 sm:$0xff] }
 0x1bd   :  { %715 = vmatpush.xpose.msk.msra.mxu3 %vm97_vm0, %v567_v57 }
 0x1be   :  { %v285_v16 = vpop.xlane.xlu1 %284 }
 0x1bf   :  { %v290_v17 = vsub.f32 %v278_v58, %v285_v16  ;;  %v497_v58 = vld [vmem:[%s1206_s16] sm:$0xff]  ;;  %713 = vmatpush.xpose.msk.msra.mxu2 %vm97_vm0, %v532_v59 }
 0x1c1   :  { %v739_v18 = vpop.eup %738  ;;  %v296_v19 = vmul.f32 1.442695, %v290_v17  ;;  %716 = vmatpush.xpose.msk.msra.mxu3 %vm97_vm0, %v566_v60 }
 0x1c2   :  { %335 = vmatmul.f32.gmra.mxu2 %v739_v18  ;;  %v350_v20 = vmul.f32 %v739_v18, %v727_v10 }
 0x1c3   :  { %740 = vpow2.f32 %v296_v19 }
 0x1c4   :  { %372 = vmatmul.f32.gmra.mxu3 %v350_v20 }
 0x1c6   :  { %v287_v21 = vpop.xlane.xlu1 %286 }
 0x1c7   :  { %v291_v22 = vsub.f32 %v279_v61, %v287_v21  ;;  %v407_v61 = vpop.permute.xlu2 %406 }
 0x1c9   :  { %v741_v23 = vpop.eup %740  ;;  %v298_v24 = vmul.f32 1.442695, %v291_v22 }
 0x1ca   :  { %338 = vmatmul.f32.gmra.mxu2 %v741_v23  ;;  %v351_v25 = vmul.f32 %v741_v23, %v727_v10 }
 0x1cb   :  { %742 = vpow2.f32 %v298_v24 }
 0x1cc   :  { %375 = vmatmul.f32.gmra.mxu3 %v351_v25 }
 0x1d1   :  { %v743_v26 = vpop.eup %742 }
 0x1d2   :  { %341 = vmatmul.f32.gmra.mxu2 %v743_v26  ;;  %v352_v27 = vmul.f32 %v743_v26, %v727_v10  ;;  %v732_v10 = vld [vmem:[%s1207_s17] ss:$0 sm:$0xff] }
 0x1d4   :  { %378 = vmatmul.f32.gmra.mxu3 %v352_v27 }
 0x1da   :  { %707 = vmatmul.msk.f32.vlgmr.msrb.gmra.mxu2 %vm97_vm0, %v433_v29 }
 0x1e2   :  { %714 = vmatmul.msk.f32.vlgmr.msra.gmra.mxu2 %vm97_vm0, %v433_v29 }
 0x23d   :  { %v333_v30 = vpop.f32.mrf.mxu2 }
 0x23f   :  { %v370_v31 = vpop.f32.mrf.mxu3 }
 0x245   :  { %v336_v32 = vpop.f32.mrf.mxu2 }
 0x247   :  { %v373_v33 = vpop.f32.mrf.mxu3 }
 0x24d   :  { %v339_v35 = vpop.f32.mrf.mxu2 }
 0x24e   :  { %744 = vrcp.f32 %v339_v35 }
 0x24f   :  { %v376_v36 = vpop.f32.mrf.mxu3  ;;  %746 = vrcp.f32 %v336_v32 }
 0x254   :  { %v745_v38 = vpop.eup %744 }
 0x255   :  { %v342_v37 = vpop.f32.mrf.mxu2  ;;  %v747_v39 = vpop.eup %746  ;;  %v388_v42 = vmul.f32 %v745_v38, %v376_v36 }
 0x256   :  { %748 = vrcp.f32 %v342_v37  ;;  %v387_v46 = vmul.f32 %v747_v39, %v373_v33 }
 0x257   :  { %750 = vrcp.f32 %v333_v30  ;;  %v379_v41 = vpop.f32.mrf.mxu3  ;;  %v399_v49 = vadd.f32 %v395_v45, %v388_v42 }
 0x258   :  { %v398_v50 = vadd.f32 %v395_v45, %v387_v46 }
 0x25c   :  { %v749_v40 = vpop.eup %748 }
 0x25d   :  { %v389_v43 = vmul.f32 %v749_v40, %v379_v41  ;;  %v751_v44 = vpop.eup %750  ;;  %v462_v54 = vpop.f32.mrf.mxu2 }
 0x25e   :  { %v386_v48 = vmul.f32 %v751_v44, %v370_v31  ;;  %v463_v55 = vadd.f32 %v730_v53, %v462_v54 }
 0x25f   :  { %v400_v47 = vadd.f32 %v395_v45, %v389_v43 }
 0x260   :  { %v397_v51 = vadd.f32 %v395_v45, %v386_v48  ;;  %709 = vmatmul.msk.f32.vlgmr.msrb.gmra.mxu3 %vm470_vm1, %v463_v55 }
 0x261   :  { %425 = vmatpush.msrb.mxu0 %v400_v47 }
 0x263   :  { %426 = vmatpush.msrb.mxu0 %v399_v49 }
 0x265   :  { %427 = vmatpush.msrb.mxu0 %v398_v50  ;;  %v561_v4 = vpop.f32.mrf.mxu2 }
 0x266   :  { %v562_v6 = vadd.f32 %v733_v2, %v561_v4 }
 0x267   :  { %428 = vmatpush.msrb.mxu0 %v397_v51 }
 0x268   :  { %705 = vmatmul.msk.f32.vlgmr.msrb.gmra.mxu0 %vm409_vm2, %v401_v52  ;;  %717 = vmatmul.msk.f32.vlgmr.msra.gmra.mxu3 %vm97_vm0, %v433_v29  ;;  %565 = vst.msk [vmem:[#allocation4] sm:$0x3] %vm564_vm4, %v562_v6 }
 0x269   :  { %710 = vmatpush.xpose.msk.msra.mxu0 %vm470_vm1, %v497_v58  ;;  %645 = dma.vmem_to_hbm [thread:$0]  %s641_s5, 32, %s643_s10, [#allocation5]  }
 0x26d   :  { %718 = vmatpush.xpose.msk.msrb.mxu0 %vm97_vm0, %v434_v28 }
 0x2e3   :  { %v494_v1 = vpop.f32.mrf.mxu3 }
 0x2e4   :  { %v495_v9 = vadd.f32 %v731_v8, %v494_v1 }
 0x2e5   :  { %v430_v62 = vpop.f32.mrf.mxu0 }
 0x2e6   :  { %v431_v63 = vadd.f32 %v430_v62, %v407_v61 }
 0x2e8   :  { %711 = vmatmul.msk.f32.vlgmr.msra.gmra.mxu0 %vm470_vm1, %v431_v63 }
 0x2eb   :  { %v595_v5 = vpop.f32.mrf.mxu3 }
 0x2ec   :  { %v596_v7 = vadd.f32 %v734_v3, %v595_v5 }
 0x2ee   :  { %599 = vst.msk [vmem:[#allocation6] sm:$0x3] %vm598_vm3, %v596_v7 }
 0x2ef   :  { %656 = dma.vmem_to_hbm [thread:$0]  %s652_s12, 32, %s654_s26, [#allocation7]  }
 0x2f0   :  { %719 = vmatmul.msk.f32.vlgmr.msrb.gmra.mxu0 %vm97_vm0, %v600_v0 }
 0x365   :  { %v521_v11 = vpop.f32.mrf.mxu0 }
 0x366   :  { %v524_v12 = vadd.f32 %v521_v11, %v495_v9 }
 0x368   :  { %v529_v13 = vadd.f32 %v732_v10, %v524_v12 }
 0x36a   :  { %531 = vst.msk [vmem:[%s1212_s22] sm:$0x3] %vm530_vm5, %v529_v13 }
 0x36d   :  { %v629_v15 = vpop.f32.mrf.mxu0 }
 0x36e   :  { %v630_v16 = vadd.f32 %v735_v14, %v629_v15 }
 0x370   :  { %632 = vst.msk [vmem:[%s1215_s25] sm:$0xff] %vm470_vm1, %v630_v16 }
 0x371   :  { %800 = dma.done.wait [#allocation5], 32  }
 0x372   :  { %801 = vsyncadd [#allocation5], 4294967264 }
 0x373   :  { %802 = dma.done.wait [#allocation7], 32  }
 0x374   :  { %803 = vsyncadd [#allocation7], 4294967264 }
 0x375   :  { %671 = vsyncpa [#allocation5], 1 }
 0x376   :  { %672 = vsyncpa [#allocation7], 1 }

// kernel: forward.2
= control target key start
LH: loop header
LB: loop body
LE: loop exit
PB: predicated region body
PF: predicated region fallthrough
CT: control target
= control target key end

     0   :  { %vm81_vm0 = vcmask 523264   ;;  %s2035_s23 = smov 64   ;;  %vm240_vm1 = vcmask 130048   ;;  %s2036_s25 = smov 48   ;;  %s2842_s2 = inlined_call_operand.vmem [shape: f32[192,64], index: 2, kind: input, shape index: {}]   ;;  %s2843_s0 = inlined_call_operand.vmem [shape: f32[32,64], index: 0, kind: input, shape index: {}]   ;;  %s2844_s3 = inlined_call_operand.vmem [shape: f32[1,192], index: 3, kind: input, shape index: {}]   ;;  %s2845_s1 = inlined_call_operand.vmem [shape: f32[2,1,16], index: 1, kind: input, shape index: {}]   ;;  %s2846_s4 = inlined_call_operand.vmem [shape: f32[64,64], index: 4, kind: input, shape index: {}]   ;;  %s2847_s5 = inlined_call_operand.vmem [shape: f32[1,64], index: 5, kind: input, shape index: {}]   ;;  %s2848_s6 = inlined_call_operand.vmem [shape: f32[1,64], index: 6, kind: input, shape index: {}]   ;;  %s2849_s8 = inlined_call_operand.vmem [shape: f32[128,64], index: 8, kind: input, shape index: {}]   ;;  %s2850_s7 = inlined_call_operand.vmem [shape: f32[1,64], index: 7, kind: input, shape index: {}]   ;;  %s2851_s9 = inlined_call_operand.vmem [shape: f32[1,128], index: 9, kind: input, shape index: {}]   ;;  %s2852_s10 = inlined_call_operand.vmem [shape: f32[64,128], index: 10, kind: input, shape index: {}]   ;;  %s2853_s11 = inlined_call_operand.vmem [shape: f32[1,64], index: 11, kind: input, shape index: {}]   ;;  %s2854_s12 = inlined_call_operand.vmem [shape: f32[1,64], index: 12, kind: input, shape index: {}]   ;;  %s2855_s13 = inlined_call_operand.vmem [shape: f32[1,64], index: 13, kind: input, shape index: {}]   ;;  %s2856_s14 = inlined_call_operand.vmem [shape: f32[32,64], index: 14, kind: output, shape index: {}]  }
   0x1   :  { %v66_v0 = vld [vmem:[%s2842_s2 + $0x78] sm:$0xff]  ;;  %v65_v1 = vld [vmem:[%s2842_s2 + $0x70] sm:$0xff]  ;;  %v64_v2 = vld [vmem:[%s2842_s2 + $0x68] sm:$0xff]  ;;  %s2038_s18 = smov 32   ;;  %s2039_s19 = smov 96  }
   0x2   :  { %1746 = vmatpush.xpose.msk.msra.mxu0 %vm81_vm0, %v66_v0  ;;  %v63_v3 = vld [vmem:[%s2842_s2 + $0x60] sm:$0xff]  ;;  %v62_v4 = vld [vmem:[%s2842_s2 + $0x58] sm:$0xff]  ;;  %v61_v5 = vld [vmem:[%s2842_s2 + $0x50] sm:$0xff] }
   0x3   :  { %v60_v6 = vld [vmem:[%s2842_s2 + $0x48] sm:$0xff]  ;;  %v59_v7 = vld [vmem:[%s2842_s2 + $0x40] sm:$0xff]  ;;  %v58_v8 = vld [vmem:[%s2842_s2 + $0x38] sm:$0xff] }
   0x4   :  { %v57_v9 = vld [vmem:[%s2842_s2 + $0x30] sm:$0xff]  ;;  %v56_v10 = vld [vmem:[%s2842_s2 + $0x28] sm:$0xff]  ;;  %v55_v11 = vld [vmem:[%s2842_s2 + $0x20] sm:$0xff] }
   0x5   :  { %v54_v12 = vld [vmem:[%s2842_s2 + $0x18] sm:$0xff]  ;;  %v53_v13 = vld [vmem:[%s2842_s2 + $0x10] sm:$0xff]  ;;  %v52_v14 = vld [vmem:[%s2842_s2 + $0x8] sm:$0xff] }
   0x6   :  { %1747 = vmatpush.xpose.msk.msra.mxu0 %vm81_vm0, %v65_v1  ;;  %v51_v15 = vld [vmem:[%s2842_s2] sm:$0xff]  ;;  %v48_v17 = vld [vmem:[%s2843_s0 + $0x8] sm:$0xff]  ;;  %v49_v18 = vld [vmem:[%s2843_s0 + $0x10] sm:$0xff] }
   0x7   :  { %v47_v16 = vld [vmem:[%s2843_s0] sm:$0xff]  ;;  %v50_v19 = vld [vmem:[%s2843_s0 + $0x18] sm:$0xff]  ;;  %v73_v32 = vld [vmem:[%s2842_s2 + $0xb0] sm:$0xff] }
   0x8   :  { %v2201_v21 = vld [vmem:[%s2844_s3] sm:$0x3]  ;;  %v74_v31 = vld [vmem:[%s2842_s2 + $0xb8] sm:$0xff]  ;;  %v72_v34 = vld [vmem:[%s2842_s2 + $0xa8] sm:$0xff] }
   0x9   :  { %v77_v22 = vperm.slane %v2201_v21, 0  ;;  %1766 = vmatpush.xpose.msk.msra.mxu1 %vm81_vm0, %v74_v31  ;;  %v71_v35 = vld [vmem:[%s2842_s2 + $0xa0] sm:$0xff]  ;;  %v70_v37 = vld [vmem:[%s2842_s2 + $0x98] sm:$0xff]  ;;  %v69_v38 = vld [vmem:[%s2842_s2 + $0x90] sm:$0xff]  ;;  %v78_v61 = vperm.slane %v2201_v21, 1 }
   0xa   :  { %1748 = vmatpush.xpose.msk.msra.mxu0 %vm81_vm0, %v64_v2  ;;  %v68_v40 = vld [vmem:[%s2842_s2 + $0x88] sm:$0xff]  ;;  %v67_v41 = vld [vmem:[%s2842_s2 + $0x80] sm:$0xff] }
   0xb   :  { %v2267_v42 = vld [vmem:[%s2845_s1] ss:$0 sm:$0xff]  ;;  %v2276_v51 = vld [vmem:[%s2845_s1 + $0x1] ss:$0 sm:$0xff]  ;;  %s2037_s1 = smov 112  }
   0xd   :  { %1767 = vmatpush.xpose.msk.msra.mxu1 %vm81_vm0, %v73_v32 }
   0xe   :  { %1749 = vmatpush.xpose.msk.msra.mxu0 %vm81_vm0, %v63_v3 }
  0x11   :  { %1768 = vmatpush.xpose.msk.msra.mxu1 %vm81_vm0, %v72_v34 }
  0x12   :  { %1750 = vmatpush.xpose.msk.msra.mxu0 %vm81_vm0, %v62_v4 }
  0x15   :  { %1769 = vmatpush.xpose.msk.msra.mxu1 %vm81_vm0, %v71_v35 }
  0x16   :  { %1751 = vmatpush.xpose.msk.msra.mxu0 %vm81_vm0, %v61_v5 }
  0x19   :  { %1770 = vmatpush.xpose.msk.msra.mxu1 %vm81_vm0, %v70_v37 }
  0x1a   :  { %1752 = vmatpush.xpose.msk.msra.mxu0 %vm81_vm0, %v60_v6 }
  0x1d   :  { %1771 = vmatpush.xpose.msk.msra.mxu1 %vm81_vm0, %v69_v38 }
  0x1e   :  { %1753 = vmatpush.xpose.msk.msra.mxu0 %vm81_vm0, %v59_v7 }
  0x21   :  { %1772 = vmatpush.xpose.msk.msra.mxu1 %vm81_vm0, %v68_v40 }
  0x22   :  { %1754 = vmatpush.xpose.msk.msra.mxu0 %vm81_vm0, %v58_v8 }
  0x25   :  { %1773 = vmatpush.xpose.msk.msra.mxu1 %vm81_vm0, %v67_v41 }
  0x26   :  { %1755 = vmatpush.xpose.msk.msra.mxu0 %vm81_vm0, %v57_v9 }
  0x28   :  { %1774 = vmatmul.msk.f32.vlgmr.msra.gmra.mxu1 %vm81_vm0, %v47_v16 }
  0x2a   :  { %1756 = vmatpush.xpose.msk.msra.mxu0 %vm81_vm0, %v56_v10 }
  0x2e   :  { %1757 = vmatpush.xpose.msk.msra.mxu0 %vm81_vm0, %v55_v11 }
  0x30   :  { %1775 = vmatmul.msk.f32.gmra.mxu1 %vm81_vm0, %v48_v17 }
  0x32   :  { %1758 = vmatpush.xpose.msk.msra.mxu0 %vm81_vm0, %v54_v12 }
  0x36   :  { %1759 = vmatpush.xpose.msk.msra.mxu0 %vm81_vm0, %v53_v13 }
  0x38   :  { %1776 = vmatmul.msk.f32.gmra.mxu1 %vm81_vm0, %v49_v18 }
  0x3a   :  { %1760 = vmatpush.xpose.msk.msra.mxu0 %vm81_vm0, %v52_v14 }
  0x3e   :  { %1761 = vmatpush.xpose.msk.msra.mxu0 %vm81_vm0, %v51_v15 }
  0x40   :  { %1777 = vmatmul.msk.f32.gmra.mxu1 %vm81_vm0, %v50_v19 }
  0x41   :  { %1762 = vmatmul.msk.f32.vlgmr.msra.gmra.mxu0 %vm81_vm0, %v47_v16 }
  0x49   :  { %1763 = vmatmul.msk.f32.gmra.mxu0 %vm81_vm0, %v48_v17 }
  0x51   :  { %1764 = vmatmul.msk.f32.gmra.mxu0 %vm81_vm0, %v49_v18 }
  0x59   :  { %1765 = vmatmul.msk.f32.gmra.mxu0 %vm81_vm0, %v50_v19 }
  0xa5   :  { %v212_v60 = vpop.f32.mrf.mxu1 }
  0xa6   :  { %v2293_v63 = vadd.f32 %v212_v60, %v78_v61 }
  0xad   :  { %v215_v62 = vpop.f32.mrf.mxu1 }
  0xae   :  { %v2295_v0 = vadd.f32 %v215_v62, %v78_v61 }
  0xbe   :  { %v183_v20 = vpop.f32.mrf.mxu0 }
  0xbf   :  { %v2207_v26 = vadd.f32 %v183_v20, %v77_v22 }
  0xc6   :  { %v186_v23 = vpop.f32.mrf.mxu0 }
  0xc7   :  { %v2204_v24 = vadd.f32 %v186_v23, %v77_v22  ;;  %v218_v23 = vpop.f32.mrf.mxu1 }
  0xc9   :  { %238 = vrot.lane.b32.xlu0 %v2204_v24, %s2035_s23 }
  0xce   :  { %v189_v25 = vpop.f32.mrf.mxu0 }
  0xcf   :  { %v2213_v29 = vadd.f32 %v189_v25, %v77_v22  ;;  %v221_v25 = vpop.f32.mrf.mxu1 }
  0xd1   :  { %236 = vrot.lane.b32.xlu0 %v2207_v26, %s2035_s23 }
  0xd6   :  { %v192_v27 = vpop.f32.mrf.mxu0 }
  0xd7   :  { %v2210_v28 = vadd.f32 %v192_v27, %v77_v22  ;;  %v219_v27 = vadd.f32 %v218_v23, %v78_v61 }
  0xd9   :  { %276 = vrot.lane.b32.xlu1 %v2210_v28, %s2035_s23 }
  0xe1   :  { %274 = vrot.lane.b32.xlu1 %v2213_v29, %s2035_s23 }
 0x13b   :  { %v239_v30 = vpop.permute.xlu0 %238 }
 0x13c   :  { %1778 = vmatpush.xpose.msk.msra.mxu2 %vm240_vm1, %v239_v30  ;;  %v222_v30 = vadd.f32 %v221_v25, %v78_v61 }
 0x13e   :  { %v2311_v32 = vpack.i.bf16 %v219_v27, %v222_v30 }
 0x143   :  { %v237_v33 = vpop.permute.xlu0 %236 }
 0x144   :  { %1779 = vmatpush.xpose.msk.msra.mxu2 %vm240_vm1, %v237_v33 }
 0x147   :  { %1780 = vmatmul.msk.f32.vlgmr.msra.gmra.mxu2 %vm240_vm1, %v2207_v26 }
 0x148   :  { %387 = vmatpush.msrb.mxu2 %v2295_v0 }
 0x14a   :  { %388 = vmatpush.msrb.mxu2 %v2293_v63 }
 0x14b   :  { %v277_v36 = vpop.permute.xlu1 %276 }
 0x14c   :  { %1782 = vmatpush.xpose.msk.msra.mxu3 %vm240_vm1, %v277_v36 }
 0x14f   :  { %1781 = vmatmul.msk.f32.gmra.mxu2 %vm240_vm1, %v2204_v24 }
 0x153   :  { %v275_v39 = vpop.permute.xlu1 %274 }
 0x154   :  { %1783 = vmatpush.xpose.msk.msra.mxu3 %vm240_vm1, %v275_v39 }
 0x157   :  { %1784 = vmatmul.msk.f32.vlgmr.msra.gmra.mxu3 %vm240_vm1, %v2213_v29 }
 0x158   :  { %416 = vmatpush.msrb.mxu3 %v222_v30 }
 0x15a   :  { %417 = vmatpush.msrb.mxu3 %v219_v27 }
 0x15f   :  { %1785 = vmatmul.msk.f32.gmra.mxu3 %vm240_vm1, %v2210_v28 }
 0x1ca   :  { %v266_v43 = vpop.f32.mrf.mxu2 }
 0x1cb   :  { %v309_v44 = vmul.f32 0.25, %v266_v43 }
 0x1cd   :  { %v319_v45 = vadd.f32 %v2267_v42, %v309_v44 }
 0x1cf   :  { %v323_v46 = vsel %vm240_vm1, %v319_v45, -inf }
 0x1d0   :  { %324 = vmax.xlane.f32.xlu2 %v323_v46 }
 0x1d2   :  { %v269_v47 = vpop.f32.mrf.mxu2 }
 0x1d3   :  { %v310_v48 = vmul.f32 0.25, %v269_v47 }
 0x1d5   :  { %v320_v49 = vadd.f32 %v2267_v42, %v310_v48 }
 0x1d7   :  { %v326_v50 = vsel %vm240_vm1, %v320_v49, -inf }
 0x1d8   :  { %327 = vmax.xlane.f32.xlu2 %v326_v50 }
 0x1da   :  { %v303_v52 = vpop.f32.mrf.mxu3 }
 0x1db   :  { %v311_v53 = vmul.f32 0.25, %v303_v52 }
 0x1dd   :  { %v321_v54 = vadd.f32 %v2276_v51, %v311_v53 }
 0x1df   :  { %v329_v55 = vsel %vm240_vm1, %v321_v54, -inf }
 0x1e0   :  { %330 = vmax.xlane.f32.xlu0 %v329_v55 }
 0x1e2   :  { %v306_v56 = vpop.f32.mrf.mxu3 }
 0x1e3   :  { %v312_v57 = vmul.f32 0.25, %v306_v56 }
 0x1e5   :  { %v322_v58 = vadd.f32 %v2276_v51, %v312_v57 }
 0x1e7   :  { %v332_v59 = vsel %vm240_vm1, %v322_v58, -inf }
 0x1e8   :  { %333 = vmax.xlane.f32.xlu1 %v332_v59 }
 0x1f0   :  { %431 = vrot.lane.b32.xlu2 %v2204_v24, %s2036_s25 }
 0x1f4   :  { %429 = vrot.lane.b32.xlu0 %v2207_v26, %s2036_s25 }
 0x1f8   :  { %425 = vrot.lane.b32.xlu2 %v2207_v26, %s2037_s1 }
 0x1fc   :  { %468 = vrot.lane.b32.xlu0 %v2213_v29, %s2036_s25 }
 0x204   :  { %466 = vrot.lane.b32.xlu0 %v2210_v28, %s2037_s1 }
 0x243   :  { %v325_v1 = vpop.xlane.xlu2 %324 }
 0x244   :  { %v335_v2 = vsub.f32 %v319_v45, %v325_v1 }
 0x246   :  { %v339_v3 = vmul.f32 1.442695, %v335_v2 }
 0x248   :  { %1941 = vpow2.f32 %v339_v3 }
 0x24b   :  { %v328_v4 = vpop.xlane.xlu2 %327 }
 0x24c   :  { %v336_v5 = vsub.f32 %v320_v49, %v328_v4 }
 0x24e   :  { %v1942_v6 = vpop.eup %1941  ;;  %v341_v7 = vmul.f32 1.442695, %v336_v5 }
 0x24f   :  { %v347_v8 = vsel %vm240_vm1, %v1942_v6, 0.0 }
 0x250   :  { %1943 = vpow2.f32 %v341_v7  ;;  %348 = vadd.xlane.f32.xlu2 %v347_v8 }
 0x253   :  { %v432_v9 = vpop.permute.xlu2 %431  ;;  %v331_v10 = vpop.xlane.xlu0 %330 }
 0x254   :  { %v337_v11 = vsub.f32 %v321_v54, %v331_v10  ;;  %1790 = vmatpush.xpose.msk.msra.mxu2 %vm240_vm1, %v432_v9  ;;  %v2341_v10 = vpack.i.bf16 %v2293_v63, %v2295_v0  ;;  %v2362_v63 = vld [vmem:[%s2846_s4 + $0x18] sm:$0xff]  ;;  %v2369_v0 = vld [vmem:[%s2846_s4 + $0x8] sm:$0xff] }
 0x256   :  { %v1944_v12 = vpop.eup %1943  ;;  %v343_v13 = vmul.f32 1.442695, %v337_v11  ;;  %v2348_v11 = vld [vmem:[%s2846_s4 + $0x38] sm:$0xff] }
 0x257   :  { %v350_v14 = vsel %vm240_vm1, %v1944_v12, 0.0 }
 0x258   :  { %1945 = vpow2.f32 %v343_v13  ;;  %351 = vadd.xlane.f32.xlu2 %v350_v14 }
 0x25b   :  { %v334_v15 = vpop.xlane.xlu1 %333  ;;  %v426_v31 = vpop.permute.xlu2 %425 }
 0x25c   :  { %v338_v16 = vsub.f32 %v322_v58, %v334_v15 }
 0x25e   :  { %v1946_v17 = vpop.eup %1945  ;;  %v345_v18 = vmul.f32 1.442695, %v338_v16 }
 0x25f   :  { %v353_v19 = vsel %vm240_vm1, %v1946_v17, 0.0 }
 0x260   :  { %1947 = vpow2.f32 %v345_v18  ;;  %354 = vadd.xlane.f32.xlu2 %v353_v19 }
 0x266   :  { %v1948_v20 = vpop.eup %1947  ;;  %v430_v21 = vpop.permute.xlu0 %429 }
 0x267   :  { %1791 = vmatpush.xpose.msk.msra.mxu2 %vm240_vm1, %v430_v21  ;;  %v356_v22 = vsel %vm240_vm1, %v1948_v20, 0.0 }
 0x268   :  { %357 = vadd.xlane.f32.xlu1 %v356_v22 }
 0x26e   :  { %v469_v45 = vpop.permute.xlu0 %468 }
 0x276   :  { %v467_v50 = vpop.permute.xlu0 %466 }
 0x278   :  { %470 = vrot.lane.b32.xlu2 %v2210_v28, %s2036_s25 }
 0x280   :  { %464 = vrot.lane.b32.xlu2 %v2213_v29, %s2037_s1 }
 0x281   :  { %427 = vrot.lane.b32.xlu1 %v2204_v24, %s2037_s1 }
 0x2c3   :  { %v349_v33 = vpop.xlane.xlu2 %348 }
 0x2c4   :  { %1949 = vrcp.f32 %v349_v33 }
 0x2ca   :  { %v1950_v34 = vpop.eup %1949 }
 0x2cb   :  { %v352_v35 = vpop.xlane.xlu2 %351  ;;  %v363_v36 = vmul.f32 %v1950_v34, %v1942_v6 }
 0x2cc   :  { %1951 = vrcp.f32 %v352_v35 }
 0x2cd   :  { %1786 = vmatmul.msk.f32.vlgmr.msrb.gmra.mxu2 %vm240_vm1, %v363_v36 }
 0x2d2   :  { %v1952_v37 = vpop.eup %1951 }
 0x2d3   :  { %v355_v38 = vpop.xlane.xlu2 %354  ;;  %v364_v39 = vmul.f32 %v1952_v37, %v1944_v12  ;;  %v2355_v12 = vld [vmem:[%s2846_s4 + $0x28] sm:$0xff] }
 0x2d4   :  { %1953 = vrcp.f32 %v355_v38 }
 0x2d5   :  { %1787 = vmatmul.msk.f32.gmra.mxu2 %vm240_vm1, %v364_v39 }
 0x2da   :  { %v1954_v40 = vpop.eup %1953 }
 0x2db   :  { %v358_v41 = vpop.xlane.xlu1 %357  ;;  %v471_v43 = vpop.permute.xlu2 %470  ;;  %v365_v44 = vmul.f32 %v1954_v40, %v1946_v17 }
 0x2dc   :  { %1955 = vrcp.f32 %v358_v41  ;;  %1794 = vmatpush.xpose.msk.msra.mxu3 %vm240_vm1, %v471_v43  ;;  %v2386_v41 = vld [vmem:[%s2846_s4 + $0x30] sm:$0xff]  ;;  %v2395_v43 = vld [vmem:[%s2846_s4 + $0x20] sm:$0xff] }
 0x2dd   :  { %1788 = vmatmul.msk.f32.vlgmr.msrb.gmra.mxu3 %vm240_vm1, %v365_v44  ;;  %1792 = vmatmul.msk.f32.vlgmr.msra.gmra.mxu2 %vm240_vm1, %v426_v31  ;;  %v2406_v44 = vld [vmem:[%s2846_s4 + $0x10] sm:$0xff] }
 0x2e0   :  { %1795 = vmatpush.xpose.msk.msra.mxu3 %vm240_vm1, %v469_v45  ;;  %v2417_v45 = vld [vmem:[%s2846_s4] sm:$0xff]  ;;  %s2040_s4 = smov 16  }
 0x2e2   :  { %v1956_v46 = vpop.eup %1955 }
 0x2e3   :  { %v366_v47 = vmul.f32 %v1956_v46, %v1948_v20  ;;  %v465_v48 = vpop.permute.xlu2 %464 }
 0x2e5   :  { %1789 = vmatmul.msk.f32.gmra.mxu3 %vm240_vm1, %v366_v47 }
 0x2ed   :  { %1796 = vmatmul.msk.f32.vlgmr.msra.gmra.mxu3 %vm240_vm1, %v465_v48 }
 0x2f3   :  { %v428_v49 = vpop.permute.xlu1 %427 }
 0x2f4   :  { %1793 = vmatmul.msk.f32.gmra.mxu2 %vm240_vm1, %v428_v49 }
 0x2f5   :  { %1797 = vmatmul.msk.f32.gmra.mxu3 %vm240_vm1, %v467_v50 }
 0x350   :  { %v2323_v52 = vpop.f32.mrf.mxu2 }
 0x358   :  { %v2325_v53 = vpop.f32.mrf.mxu2 }
 0x360   :  { %v2327_v54 = vpop.f32.mrf.mxu3  ;;  %v458_v55 = vpop.f32.mrf.mxu2 }
 0x361   :  { %v503_v56 = vmul.f32 0.25, %v458_v55 }
 0x363   :  { %v507_v57 = vadd.f32 %v2267_v42, %v503_v56 }
 0x365   :  { %v511_v58 = vsel %vm240_vm1, %v507_v57, -inf }
 0x366   :  { %512 = vmax.xlane.f32.xlu2 %v511_v58 }
 0x368   :  { %v2331_v59 = vpop.f32.mrf.mxu3 }
 0x370   :  { %v497_v60 = vpop.f32.mrf.mxu3 }
 0x371   :  { %v505_v61 = vmul.f32 0.25, %v497_v60 }
 0x373   :  { %v509_v62 = vadd.f32 %v2276_v51, %v505_v61 }
 0x375   :  { %v517_v1 = vsel %vm240_vm1, %v509_v62, -inf }
 0x376   :  { %518 = vmax.xlane.f32.xlu0 %v517_v1 }
 0x377   :  { %v461_v2 = vpop.f32.mrf.mxu2 }
 0x378   :  { %v504_v3 = vmul.f32 0.25, %v461_v2  ;;  %v500_v4 = vpop.f32.mrf.mxu3 }
 0x379   :  { %v506_v5 = vmul.f32 0.25, %v500_v4 }
 0x37a   :  { %v508_v6 = vadd.f32 %v2267_v42, %v504_v3 }
 0x37b   :  { %v510_v7 = vadd.f32 %v2276_v51, %v506_v5 }
 0x37c   :  { %v514_v8 = vsel %vm240_vm1, %v508_v6, -inf }
 0x37d   :  { %515 = vmax.xlane.f32.xlu1 %v514_v8  ;;  %v520_v9 = vsel %vm240_vm1, %v510_v7, -inf }
 0x37e   :  { %521 = vmax.xlane.f32.xlu2 %v520_v9 }
 0x38a   :  { %1903 = vrot.lane.b32.xlu0 %v2341_v10, %s2037_s1 }
 0x392   :  { %651 = vrot.lane.b32.xlu0 %v2348_v11, %s2037_s1 }
 0x39a   :  { %647 = vrot.lane.b32.xlu0 %v2355_v12, %s2037_s1 }
 0x3a2   :  { %643 = vrot.lane.b32.xlu0 %v2362_v63, %s2037_s1 }
 0x3aa   :  { %639 = vrot.lane.b32.xlu0 %v2369_v0, %s2037_s1 }
 0x3b2   :  { %771 = vrot.lane.b32.xlu0 %v2207_v26, %s2038_s18 }
 0x3ba   :  { %808 = vrot.lane.b32.xlu0 %v2210_v28, %s2039_s19 }
 0x3d9   :  { %v513_v13 = vpop.xlane.xlu2 %512 }
 0x3da   :  { %v523_v14 = vsub.f32 %v507_v57, %v513_v13 }
 0x3dc   :  { %v527_v15 = vmul.f32 1.442695, %v523_v14 }
 0x3de   :  { %1957 = vpow2.f32 %v527_v15 }
 0x3e4   :  { %v1958_v16 = vpop.eup %1957 }
 0x3e5   :  { %v535_v17 = vsel %vm240_vm1, %v1958_v16, 0.0 }
 0x3e6   :  { %536 = vadd.xlane.f32.xlu1 %v535_v17 }
 0x3e9   :  { %v519_v18 = vpop.xlane.xlu0 %518 }
 0x3ea   :  { %v525_v19 = vsub.f32 %v509_v62, %v519_v18 }
 0x3ec   :  { %v531_v20 = vmul.f32 1.442695, %v525_v19 }
 0x3ee   :  { %1959 = vpow2.f32 %v531_v20 }
 0x3f0   :  { %v516_v21 = vpop.xlane.xlu1 %515 }
 0x3f1   :  { %v524_v22 = vsub.f32 %v508_v6, %v516_v21  ;;  %v522_v23 = vpop.xlane.xlu2 %521 }
 0x3f2   :  { %v526_v25 = vsub.f32 %v510_v7, %v522_v23 }
 0x3f3   :  { %v529_v27 = vmul.f32 1.442695, %v524_v22 }
 0x3f4   :  { %v1960_v30 = vpop.eup %1959  ;;  %v533_v31 = vmul.f32 1.442695, %v526_v25 }
 0x3f5   :  { %1961 = vpow2.f32 %v529_v27  ;;  %v541_v33 = vsel %vm240_vm1, %v1960_v30, 0.0 }
 0x3f6   :  { %1963 = vpow2.f32 %v533_v31  ;;  %542 = vadd.xlane.f32.xlu1 %v541_v33 }
 0x3fb   :  { %v1962_v34 = vpop.eup %1961 }
 0x3fc   :  { %v1964_v35 = vpop.eup %1963  ;;  %v1904_v36 = vpop.permute.xlu0 %1903  ;;  %v538_v37 = vsel %vm240_vm1, %v1962_v34, 0.0 }
 0x3fd   :  { %v1905_v38 = vunpack.i.l.bf16 %v1904_v36  ;;  %539 = vadd.xlane.f32.xlu2 %v538_v37  ;;  %v544_v39 = vsel %vm240_vm1, %v1964_v35, 0.0  ;;  %v1906_v40 = vunpack.i.h.bf16 %v1904_v36 }
 0x3fe   :  { %545 = vadd.xlane.f32.xlu1 %v544_v39 }
 0x3ff   :  { %583 = vmatpush.msrb.mxu2 %v1905_v38 }
 0x401   :  { %584 = vmatpush.msrb.mxu2 %v1906_v40 }
 0x403   :  { %1814 = vmatpush.xpose.msk.msra.mxu2 %vm240_vm1, %v2348_v11 }
 0x404   :  { %v652_v2 = vpop.permute.xlu0 %651 }
 0x407   :  { %1815 = vmatpush.xpose.msk.msra.mxu2 %vm240_vm1, %v2386_v41 }
 0x40b   :  { %1816 = vmatpush.xpose.msk.msra.mxu2 %vm240_vm1, %v2355_v12 }
 0x40c   :  { %v648_v5 = vpop.permute.xlu0 %647 }
 0x40f   :  { %1817 = vmatpush.xpose.msk.msra.mxu2 %vm240_vm1, %v2395_v43 }
 0x413   :  { %1818 = vmatpush.xpose.msk.msra.mxu2 %vm240_vm1, %v2362_v63 }
 0x414   :  { %v644_v8 = vpop.permute.xlu0 %643 }
 0x415   :  { %1908 = vrot.lane.b32.xlu2 %v2311_v32, %s2037_s1 }
 0x417   :  { %1819 = vmatpush.xpose.msk.msra.mxu2 %vm240_vm1, %v2406_v44  ;;  %649 = vrot.lane.b32.xlu1 %v2386_v41, %s2037_s1 }
 0x41b   :  { %1820 = vmatpush.xpose.msk.msra.mxu2 %vm240_vm1, %v2369_v0 }
 0x41c   :  { %v640_v9 = vpop.permute.xlu0 %639 }
 0x41d   :  { %645 = vrot.lane.b32.xlu2 %v2395_v43, %s2037_s1 }
 0x41f   :  { %1821 = vmatpush.xpose.msk.msra.mxu2 %vm240_vm1, %v2417_v45  ;;  %637 = vrot.lane.b32.xlu1 %v2417_v45, %s2037_s1 }
 0x424   :  { %v772_v14 = vpop.permute.xlu0 %771 }
 0x425   :  { %641 = vrot.lane.b32.xlu2 %v2406_v44, %s2037_s1  ;;  %s2041_s1 = smov 80  }
 0x427   :  { %767 = vrot.lane.b32.xlu1 %v2207_v26, %s2039_s19 }
 0x42c   :  { %v809_v22 = vpop.permute.xlu0 %808 }
 0x42d   :  { %773 = vrot.lane.b32.xlu2 %v2204_v24, %s2038_s18 }
 0x435   :  { %769 = vrot.lane.b32.xlu2 %v2204_v24, %s2039_s19 }
 0x43d   :  { %812 = vrot.lane.b32.xlu2 %v2210_v28, %s2038_s18 }
 0x445   :  { %810 = vrot.lane.b32.xlu2 %v2213_v29, %s2038_s18 }
 0x44d   :  { %806 = vrot.lane.b32.xlu2 %v2213_v29, %s2039_s19 }
 0x459   :  { %v537_v46 = vpop.xlane.xlu1 %536 }
 0x45a   :  { %1965 = vrcp.f32 %v537_v46 }
 0x460   :  { %v1966_v47 = vpop.eup %1965 }
 0x461   :  { %v551_v48 = vmul.f32 %v1966_v47, %v1958_v16 }
 0x463   :  { %1798 = vmatmul.msk.f32.vlgmr.msrb.gmra.mxu2 %vm240_vm1, %v551_v48 }
 0x469   :  { %v543_v49 = vpop.xlane.xlu1 %542 }
 0x470   :  { %v540_v50 = vpop.xlane.xlu2 %539 }
 0x471   :  { %1967 = vrcp.f32 %v540_v50  ;;  %v546_v56 = vpop.xlane.xlu1 %545 }
 0x472   :  { %1969 = vrcp.f32 %v543_v49 }
 0x473   :  { %1971 = vrcp.f32 %v546_v56 }
 0x477   :  { %v1968_v55 = vpop.eup %1967 }
 0x478   :  { %v1909_v57 = vpop.permute.xlu2 %1908  ;;  %v552_v58 = vmul.f32 %v1968_v55, %v1962_v34  ;;  %v1970_v60 = vpop.eup %1969 }
 0x479   :  { %v1910_v61 = vunpack.i.l.bf16 %v1909_v57  ;;  %v1911_v62 = vunpack.i.h.bf16 %v1909_v57  ;;  %v553_v1 = vmul.f32 %v1970_v60, %v1960_v30  ;;  %v1972_v3 = vpop.eup %1971 }
 0x47a   :  { %1799 = vmatmul.msk.f32.gmra.mxu2 %vm240_vm1, %v552_v58  ;;  %v554_v4 = vmul.f32 %v1972_v3, %v1964_v35 }
 0x47b   :  { %620 = vmatpush.msrb.mxu3 %v1910_v61 }
 0x47d   :  { %621 = vmatpush.msrb.mxu3 %v1911_v62 }
 0x47e   :  { %1800 = vmatmul.msk.f32.vlgmr.msrb.gmra.mxu3 %vm240_vm1, %v553_v1 }
 0x47f   :  { %1802 = vmatpush.xpose.msk.msra.mxu3 %vm240_vm1, %v652_v2 }
 0x480   :  { %v646_v7 = vpop.permute.xlu2 %645 }
 0x482   :  { %1822 = vmatmul.msk.f32.vlgmr.msra.gmra.mxu2 %vm240_vm1, %v2323_v52 }
 0x486   :  { %1801 = vmatmul.msk.f32.gmra.mxu3 %vm240_vm1, %v554_v4 }
 0x488   :  { %v642_v52 = vpop.permute.xlu2 %641 }
 0x489   :  { %v650_v6 = vpop.permute.xlu1 %649 }
 0x48a   :  { %1803 = vmatpush.xpose.msk.msra.mxu3 %vm240_vm1, %v650_v6  ;;  %1823 = vmatmul.msk.f32.gmra.mxu2 %vm240_vm1, %v2325_v53 }
 0x48e   :  { %1804 = vmatpush.xpose.msk.msra.mxu3 %vm240_vm1, %v648_v5 }
 0x490   :  { %v774_v13 = vpop.permute.xlu2 %773 }
 0x491   :  { %v638_v53 = vpop.permute.xlu1 %637 }
 0x492   :  { %1805 = vmatpush.xpose.msk.msra.mxu3 %vm240_vm1, %v646_v7  ;;  %1824 = vmatmul.msk.f32.gmra.mxu2 %vm240_vm1, %v2327_v54 }
 0x496   :  { %1806 = vmatpush.xpose.msk.msra.mxu3 %vm240_vm1, %v644_v8 }
 0x498   :  { %v770_v54 = vpop.permute.xlu2 %769 }
 0x499   :  { %v768_v20 = vpop.permute.xlu1 %767 }
 0x49a   :  { %1807 = vmatpush.xpose.msk.msra.mxu3 %vm240_vm1, %v642_v52  ;;  %1825 = vmatmul.msk.f32.gmra.mxu2 %vm240_vm1, %v2331_v59 }
 0x49e   :  { %1808 = vmatpush.xpose.msk.msra.mxu3 %vm240_vm1, %v640_v9 }
 0x4a0   :  { %v813_v15 = vpop.permute.xlu2 %812 }
 0x4a2   :  { %1809 = vmatpush.xpose.msk.msra.mxu3 %vm240_vm1, %v638_v53 }
 0x4a6   :  { %1826 = vmatpush.xpose.msk.msrb.mxu3 %vm240_vm1, %v774_v13 }
 0x4a8   :  { %v811_v59 = vpop.permute.xlu2 %810 }
 0x4aa   :  { %1827 = vmatpush.xpose.msk.msrb.mxu3 %vm240_vm1, %v772_v14 }
 0x4b0   :  { %v807_v21 = vpop.permute.xlu2 %806 }
 0x4e6   :  { %v586_v16 = vpop.f32.mrf.mxu2 }
 0x4e7   :  { %1810 = vmatmul.msk.f32.vlgmr.msra.gmra.mxu3 %vm240_vm1, %v586_v16 }
 0x4e8   :  { %1830 = vmatpush.xpose.msk.msra.mxu3 %vm240_vm1, %v813_v15 }
 0x4ec   :  { %1831 = vmatpush.xpose.msk.msra.mxu3 %vm240_vm1, %v811_v59 }
 0x4fd   :  { %v589_v17 = vpop.f32.mrf.mxu2 }
 0x4fe   :  { %1811 = vmatmul.msk.f32.gmra.mxu3 %vm240_vm1, %v589_v17 }
 0x501   :  { %v623_v18 = vpop.f32.mrf.mxu3 }
 0x506   :  { %1812 = vmatmul.msk.f32.gmra.mxu3 %vm240_vm1, %v623_v18 }
 0x509   :  { %v626_v19 = vpop.f32.mrf.mxu3 }
 0x50e   :  { %1813 = vmatmul.msk.f32.gmra.mxu3 %vm240_vm1, %v626_v19 }
 0x516   :  { %1828 = vmatmul.msk.f32.vlgmr.msrb.gmra.mxu3 %vm240_vm1, %v768_v20 }
 0x51e   :  { %1829 = vmatmul.msk.f32.gmra.mxu3 %vm240_vm1, %v770_v54 }
 0x526   :  { %1832 = vmatmul.msk.f32.vlgmr.msra.gmra.mxu3 %vm240_vm1, %v807_v21 }
 0x52e   :  { %1833 = vmatmul.msk.f32.gmra.mxu3 %vm240_vm1, %v809_v22 }
 0x56a   :  { %v2471_v23 = vpop.f32.mrf.mxu3 }
 0x581   :  { %v2473_v25 = vpop.f32.mrf.mxu3 }
 0x589   :  { %v2475_v27 = vpop.f32.mrf.mxu3 }
 0x591   :  { %v2477_v30 = vpop.f32.mrf.mxu3 }
 0x599   :  { %v800_v31 = vpop.f32.mrf.mxu3 }
 0x59a   :  { %v845_v33 = vmul.f32 0.25, %v800_v31 }
 0x59c   :  { %v849_v34 = vadd.f32 %v2267_v42, %v845_v33 }
 0x59e   :  { %v853_v35 = vsel %vm240_vm1, %v849_v34, -inf }
 0x59f   :  { %854 = vmax.xlane.f32.xlu0 %v853_v35 }
 0x5a1   :  { %v803_v36 = vpop.f32.mrf.mxu3 }
 0x5a2   :  { %v846_v37 = vmul.f32 0.25, %v803_v36 }
 0x5a4   :  { %v850_v38 = vadd.f32 %v2267_v42, %v846_v37 }
 0x5a6   :  { %v856_v39 = vsel %vm240_vm1, %v850_v38, -inf }
 0x5a7   :  { %857 = vmax.xlane.f32.xlu1 %v856_v39 }
 0x5a9   :  { %v839_v40 = vpop.f32.mrf.mxu3 }
 0x5aa   :  { %v847_v52 = vmul.f32 0.25, %v839_v40 }
 0x5ac   :  { %v851_v9 = vadd.f32 %v2276_v51, %v847_v52 }
 0x5ae   :  { %v859_v53 = vsel %vm240_vm1, %v851_v9, -inf }
 0x5b1   :  { %v842_v46 = vpop.f32.mrf.mxu3 }
 0x5b2   :  { %v848_v47 = vmul.f32 0.25, %v842_v46 }
 0x5b3   :  { %1913 = vrot.lane.b32.xlu0 %v2341_v10, %s2039_s19 }
 0x5b4   :  { %v852_v48 = vadd.f32 %v2276_v51, %v848_v47 }
 0x5b6   :  { %v862_v49 = vsel %vm240_vm1, %v852_v48, -inf }
 0x5c0   :  { %1050 = vrot.lane.b32.xlu1 %v2204_v24, %s2040_s4 }
 0x5c8   :  { %1048 = vrot.lane.b32.xlu1 %v2207_v26, %s2040_s4 }
 0x5d0   :  { %1046 = vrot.lane.b32.xlu1 %v2204_v24, %s2041_s1 }
 0x5d8   :  { %1089 = vrot.lane.b32.xlu1 %v2210_v28, %s2040_s4 }
 0x5e0   :  { %1087 = vrot.lane.b32.xlu1 %v2213_v29, %s2040_s4 }
 0x5e8   :  { %1085 = vrot.lane.b32.xlu1 %v2210_v28, %s2041_s1 }
 0x612   :  { %v855_v50 = vpop.xlane.xlu0 %854  ;;  %863 = vmax.xlane.f32.xlu1 %v862_v49 }
 0x613   :  { %v865_v55 = vsub.f32 %v849_v34, %v855_v50 }
 0x615   :  { %v869_v56 = vmul.f32 1.442695, %v865_v55 }
 0x617   :  { %1973 = vpow2.f32 %v869_v56 }
 0x61a   :  { %v858_v24 = vpop.xlane.xlu1 %857 }
 0x61b   :  { %v866_v57 = vsub.f32 %v850_v38, %v858_v24 }
 0x61d   :  { %v1974_v58 = vpop.eup %1973  ;;  %v871_v60 = vmul.f32 1.442695, %v866_v57 }
 0x61e   :  { %v877_v61 = vsel %vm240_vm1, %v1974_v58, 0.0 }
 0x61f   :  { %1975 = vpow2.f32 %v871_v60  ;;  %878 = vadd.xlane.f32.xlu2 %v877_v61 }
 0x625   :  { %v1976_v28 = vpop.eup %1975  ;;  %v1914_v62 = vpop.permute.xlu0 %1913 }
 0x626   :  { %v880_v1 = vsel %vm240_vm1, %v1976_v28, 0.0  ;;  %v1915_v2 = vunpack.i.l.bf16 %v1914_v62  ;;  %v1916_v3 = vunpack.i.h.bf16 %v1914_v62 }
 0x627   :  { %881 = vadd.xlane.f32.xlu0 %v880_v1 }
 0x628   :  { %923 = vmatpush.msrb.mxu0 %v1915_v2 }
 0x62a   :  { %924 = vmatpush.msrb.mxu0 %v1916_v3 }
 0x632   :  { %v1051_v4 = vpop.permute.xlu1 %1050 }
 0x633   :  { %1850 = vmatpush.xpose.msk.msrb.mxu3 %vm240_vm1, %v1051_v4 }
 0x637   :  { %1044 = vrot.lane.b32.xlu2 %v2207_v26, %s2041_s1 }
 0x63a   :  { %v1049_v5 = vpop.permute.xlu1 %1048 }
 0x63b   :  { %1851 = vmatpush.xpose.msk.msrb.mxu3 %vm240_vm1, %v1049_v5 }
 0x63f   :  { %1083 = vrot.lane.b32.xlu2 %v2213_v29, %s2041_s1 }
 0x642   :  { %v1047_v6 = vpop.permute.xlu1 %1046 }
 0x64a   :  { %v1090_v7 = vpop.permute.xlu1 %1089 }
 0x64b   :  { %1854 = vmatpush.xpose.msk.msra.mxu0 %vm240_vm1, %v1090_v7 }
 0x652   :  { %v1088_v8 = vpop.permute.xlu1 %1087 }
 0x653   :  { %1855 = vmatpush.xpose.msk.msra.mxu0 %vm240_vm1, %v1088_v8 }
 0x65a   :  { %v1086_v26 = vpop.permute.xlu1 %1085 }
 0x668   :  { %860 = vmax.xlane.f32.xlu2 %v859_v53 }
 0x685   :  { %v864_v13 = vpop.xlane.xlu1 %863 }
 0x686   :  { %v868_v14 = vsub.f32 %v852_v48, %v864_v13 }
 0x688   :  { %v875_v54 = vmul.f32 1.442695, %v868_v14 }
 0x68a   :  { %1977 = vpow2.f32 %v875_v54 }
 0x690   :  { %v2507_v15 = vpop.eup %1977 }
 0x691   :  { %v886_v29 = vsel %vm240_vm1, %v2507_v15, 0.0 }
 0x692   :  { %v879_v16 = vpop.xlane.xlu2 %878  ;;  %887 = vadd.xlane.f32.xlu1 %v886_v29 }
 0x693   :  { %1979 = vrcp.f32 %v879_v16 }
 0x699   :  { %v1980_v59 = vpop.eup %1979 }
 0x69a   :  { %v1045_v17 = vpop.permute.xlu2 %1044  ;;  %v882_v18 = vpop.xlane.xlu0 %881  ;;  %v893_v19 = vmul.f32 %v1980_v59, %v1974_v58 }
 0x69b   :  { %1981 = vrcp.f32 %v882_v18  ;;  %1852 = vmatmul.msk.f32.vlgmr.msrb.gmra.mxu3 %vm240_vm1, %v1045_v17 }
 0x69c   :  { %1834 = vmatmul.msk.f32.vlgmr.msrb.gmra.mxu0 %vm240_vm1, %v893_v19 }
 0x6a1   :  { %v1982_v20 = vpop.eup %1981 }
 0x6a2   :  { %v894_v21 = vmul.f32 %v1982_v20, %v1976_v28  ;;  %v1084_v22 = vpop.permute.xlu2 %1083 }
 0x6a3   :  { %1853 = vmatmul.msk.f32.gmra.mxu3 %vm240_vm1, %v1047_v6 }
 0x6a4   :  { %1835 = vmatmul.msk.f32.gmra.mxu0 %vm240_vm1, %v894_v21 }
 0x6ab   :  { %1923 = vrot.lane.b32.xlu1 %v2341_v10, %s2041_s1 }
 0x6ac   :  { %1856 = vmatmul.msk.f32.vlgmr.msra.gmra.mxu0 %vm240_vm1, %v1084_v22 }
 0x6b4   :  { %1857 = vmatmul.msk.f32.gmra.mxu0 %vm240_vm1, %v1086_v26 }
 0x6db   :  { %v861_v31 = vpop.xlane.xlu2 %860 }
 0x6dc   :  { %v867_v33 = vsub.f32 %v851_v9, %v861_v31 }
 0x6de   :  { %v873_v34 = vmul.f32 1.442695, %v867_v33 }
 0x6e0   :  { %1983 = vpow2.f32 %v873_v34 }
 0x6e6   :  { %v2519_v35 = vpop.eup %1983 }
 0x6e7   :  { %v883_v36 = vsel %vm240_vm1, %v2519_v35, 0.0 }
 0x6e8   :  { %884 = vadd.xlane.f32.xlu2 %v883_v36 }
 0x705   :  { %v888_v17 = vpop.xlane.xlu1 %887 }
 0x719   :  { %v2523_v37 = vpop.f32.mrf.mxu0 }
 0x71d   :  { %v1924_v21 = vpop.permute.xlu1 %1923 }
 0x71e   :  { %v1077_v38 = vpop.f32.mrf.mxu3  ;;  %v1925_v33 = vunpack.i.l.bf16 %v1924_v21  ;;  %v1926_v34 = vunpack.i.h.bf16 %v1924_v21 }
 0x71f   :  { %v1122_v39 = vmul.f32 0.25, %v1077_v38 }
 0x721   :  { %v2525_v40 = vpop.f32.mrf.mxu0  ;;  %v1126_v10 = vadd.f32 %v2267_v42, %v1122_v39 }
 0x723   :  { %v1130_v46 = vsel %vm240_vm1, %v1126_v10, -inf }
 0x724   :  { %1131 = vmax.xlane.f32.xlu0 %v1130_v46 }
 0x726   :  { %v1080_v47 = vpop.f32.mrf.mxu3 }
 0x727   :  { %v1123_v48 = vmul.f32 0.25, %v1080_v47 }
 0x729   :  { %v1116_v49 = vpop.f32.mrf.mxu0  ;;  %v1127_v50 = vadd.f32 %v2267_v42, %v1123_v48 }
 0x72a   :  { %v1124_v55 = vmul.f32 0.25, %v1116_v49 }
 0x72b   :  { %v1133_v56 = vsel %vm240_vm1, %v1127_v50, -inf }
 0x72c   :  { %1134 = vmax.xlane.f32.xlu0 %v1133_v56  ;;  %v1128_v24 = vadd.f32 %v2276_v51, %v1124_v55 }
 0x72e   :  { %v1136_v60 = vsel %vm240_vm1, %v1128_v24, -inf }
 0x731   :  { %v1119_v57 = vpop.f32.mrf.mxu0 }
 0x732   :  { %v1125_v58 = vmul.f32 0.25, %v1119_v57 }
 0x734   :  { %1137 = vmax.xlane.f32.xlu0 %v1136_v60  ;;  %v1129_v61 = vadd.f32 %v2276_v51, %v1125_v58 }
 0x736   :  { %v1139_v28 = vsel %vm240_vm1, %v1129_v61, -inf }
 0x73c   :  { %1140 = vmax.xlane.f32.xlu0 %v1139_v28 }
 0x750   :  { %1918 = vrot.lane.b32.xlu0 %v2311_v32, %s2039_s19 }
 0x75b   :  { %v885_v16 = vpop.xlane.xlu2 %884 }
 0x797   :  { %v1132_v42 = vpop.xlane.xlu0 %1131 }
 0x798   :  { %v1142_v62 = vsub.f32 %v1126_v10, %v1132_v42 }
 0x79a   :  { %v1146_v1 = vmul.f32 1.442695, %v1142_v62 }
 0x79c   :  { %1985 = vpow2.f32 %v1146_v1 }
 0x79f   :  { %v1135_v2 = vpop.xlane.xlu0 %1134 }
 0x7a0   :  { %v1143_v3 = vsub.f32 %v1127_v50, %v1135_v2 }
 0x7a2   :  { %v1986_v4 = vpop.eup %1985  ;;  %v1148_v5 = vmul.f32 1.442695, %v1143_v3 }
 0x7a3   :  { %v1154_v6 = vsel %vm240_vm1, %v1986_v4, 0.0 }
 0x7a4   :  { %1987 = vpow2.f32 %v1148_v5  ;;  %1155 = vadd.xlane.f32.xlu2 %v1154_v6 }
 0x7a7   :  { %v1138_v7 = vpop.xlane.xlu0 %1137 }
 0x7a8   :  { %v1144_v51 = vsub.f32 %v1128_v24, %v1138_v7 }
 0x7aa   :  { %v1988_v8 = vpop.eup %1987  ;;  %v1150_v52 = vmul.f32 1.442695, %v1144_v51  ;;  %v755_v51 = vpop.f32.mrf.mxu2 }
 0x7ab   :  { %v1157_v9 = vsel %vm240_vm1, %v1988_v8, 0.0 }
 0x7ac   :  { %1989 = vpow2.f32 %v1150_v52  ;;  %1158 = vadd.xlane.f32.xlu2 %v1157_v9 }
 0x7af   :  { %v1141_v53 = vpop.xlane.xlu0 %1140 }
 0x7b0   :  { %v1145_v26 = vsub.f32 %v1129_v61, %v1141_v53 }
 0x7b2   :  { %v2539_v13 = vpop.eup %1989  ;;  %v1152_v14 = vmul.f32 1.442695, %v1145_v26  ;;  %v756_v26 = vadd.f32 %v755_v51, %v2471_v23 }
 0x7b3   :  { %v1160_v54 = vsel %vm240_vm1, %v2539_v13, 0.0 }
 0x7b4   :  { %1991 = vpow2.f32 %v1152_v14  ;;  %1161 = vadd.xlane.f32.xlu0 %v1160_v54  ;;  %v1934_v14 = vld [vmem:[%s2847_s5] ss:$0 sm:$0xff] }
 0x7b5   :  { %1993 = vrcp.f32 %v885_v16 }
 0x7b6   :  { %1995 = vrcp.f32 %v888_v17 }
 0x7ba   :  { %v2543_v29 = vpop.eup %1991 }
 0x7bb   :  { %v1163_v59 = vsel %vm240_vm1, %v2543_v29, 0.0  ;;  %v1994_v19 = vpop.eup %1993 }
 0x7bc   :  { %1164 = vadd.xlane.f32.xlu1 %v1163_v59  ;;  %v895_v31 = vmul.f32 %v1994_v19, %v2519_v35  ;;  %v1996_v36 = vpop.eup %1995 }
 0x7c2   :  { %v1919_v18 = vpop.permute.xlu0 %1918 }
 0x7c3   :  { %v1920_v20 = vunpack.i.l.bf16 %v1919_v18  ;;  %v1921_v22 = vunpack.i.h.bf16 %v1919_v18  ;;  %v2031_v18 = vld [vmem:[%s2843_s0] sm:$0xff] }
 0x7c4   :  { %1928 = vrot.lane.b32.xlu2 %v2311_v32, %s2041_s1  ;;  %v896_v32 = vmul.f32 %v1996_v36, %v2507_v15 }
 0x7c5   :  { %958 = vmatpush.msrb.mxu1 %v1920_v20 }
 0x7c7   :  { %959 = vmatpush.msrb.mxu1 %v1921_v22 }
 0x7c8   :  { %1836 = vmatmul.msk.f32.vlgmr.msrb.gmra.mxu1 %vm240_vm1, %v895_v31  ;;  %977 = vrot.lane.b32.xlu0 %v2355_v12, %s2039_s19 }
 0x7c9   :  { %1200 = vmatpush.msra.mxu1 %v1925_v33  ;;  %v2032_v33 = vld [vmem:[%s2843_s0 + $0x8] sm:$0xff] }
 0x7cb   :  { %1201 = vmatpush.msra.mxu1 %v1926_v34 }
 0x7cc   :  { %981 = vrot.lane.b32.xlu2 %v2348_v11, %s2039_s19 }
 0x7d0   :  { %1837 = vmatmul.msk.f32.gmra.mxu1 %vm240_vm1, %v896_v32  ;;  %973 = vrot.lane.b32.xlu0 %v2362_v63, %s2039_s19 }
 0x7d4   :  { %979 = vrot.lane.b32.xlu2 %v2386_v41, %s2039_s19 }
 0x7d5   :  { %1254 = vrot.lane.b32.xlu1 %v2355_v12, %s2041_s1 }
 0x7d8   :  { %1252 = vrot.lane.b32.xlu0 %v2395_v43, %s2041_s1 }
 0x7dc   :  { %1258 = vrot.lane.b32.xlu2 %v2348_v11, %s2041_s1 }
 0x7dd   :  { %1246 = vrot.lane.b32.xlu1 %v2369_v0, %s2041_s1 }
 0x7e0   :  { %1250 = vrot.lane.b32.xlu0 %v2362_v63, %s2041_s1 }
 0x7e4   :  { %975 = vrot.lane.b32.xlu2 %v2395_v43, %s2039_s19 }
 0x7e8   :  { %1248 = vrot.lane.b32.xlu0 %v2406_v44, %s2041_s1 }
 0x7ec   :  { %1256 = vrot.lane.b32.xlu2 %v2386_v41, %s2041_s1 }
 0x7f4   :  { %971 = vrot.lane.b32.xlu2 %v2406_v44, %s2039_s19 }
 0x7fc   :  { %969 = vrot.lane.b32.xlu2 %v2369_v0, %s2039_s19 }
 0x804   :  { %967 = vrot.lane.b32.xlu2 %v2417_v45, %s2039_s19 }
 0x80c   :  { %1244 = vrot.lane.b32.xlu2 %v2417_v45, %s2041_s1 }
 0x817   :  { %v1156_v11 = vpop.xlane.xlu2 %1155 }
 0x818   :  { %1997 = vrcp.f32 %v1156_v11 }
 0x81e   :  { %v1998_v12 = vpop.eup %1997 }
 0x81f   :  { %v1170_v63 = vmul.f32 %v1998_v12, %v1986_v4  ;;  %v1159_v43 = vpop.xlane.xlu2 %1158 }
 0x820   :  { %1999 = vrcp.f32 %v1159_v43 }
 0x821   :  { %1858 = vmatmul.msk.f32.vlgmr.msra.gmra.mxu1 %vm240_vm1, %v1170_v63 }
 0x826   :  { %v2000_v41 = vpop.eup %1999 }
 0x827   :  { %v1929_v15 = vpop.permute.xlu2 %1928  ;;  %v1162_v44 = vpop.xlane.xlu0 %1161  ;;  %v1171_v35 = vmul.f32 %v2000_v41, %v1988_v8 }
 0x828   :  { %v1930_v38 = vunpack.i.l.bf16 %v1929_v15  ;;  %2001 = vrcp.f32 %v1162_v44  ;;  %v1931_v0 = vunpack.i.h.bf16 %v1929_v15  ;;  %v758_v8 = vpop.f32.mrf.mxu2  ;;  %v2033_v44 = vld [vmem:[%s2843_s0 + $0x10] sm:$0xff] }
 0x829   :  { %1859 = vmatmul.msk.f32.gmra.mxu1 %vm240_vm1, %v1171_v35  ;;  %v759_v17 = vadd.f32 %v758_v8, %v2473_v25  ;;  %v1454_v8 = vld [vmem:[%s2849_s8 + $0x50] sm:$0xff] }
 0x82a   :  { %1235 = vmatpush.msra.mxu3 %v1930_v38 }
 0x82c   :  { %1236 = vmatpush.msra.mxu3 %v1931_v0 }
 0x82e   :  { %v2002_v45 = vpop.eup %2001 }
 0x82f   :  { %v1172_v39 = vmul.f32 %v2002_v45, %v2539_v13  ;;  %v982_v10 = vpop.permute.xlu2 %981  ;;  %v1165_v46 = vpop.xlane.xlu1 %1164 }
 0x830   :  { %2003 = vrcp.f32 %v1165_v46  ;;  %1838 = vmatpush.xpose.msk.msrb.mxu2 %vm240_vm1, %v982_v10  ;;  %v761_v52 = vpop.f32.mrf.mxu2 }
 0x831   :  { %1860 = vmatmul.msk.f32.vlgmr.msra.gmra.mxu3 %vm240_vm1, %v1172_v39  ;;  %v762_v32 = vadd.f32 %v761_v52, %v2475_v27  ;;  %v2034_v27 = vld [vmem:[%s2843_s0 + $0x18] sm:$0xff] }
 0x836   :  { %v2004_v47 = vpop.eup %2003 }
 0x837   :  { %v980_v48 = vpop.permute.xlu2 %979  ;;  %v1173_v49 = vmul.f32 %v2004_v47, %v2543_v29 }
 0x838   :  { %1839 = vmatpush.xpose.msk.msrb.mxu2 %vm240_vm1, %v980_v48  ;;  %v764_v9 = vpop.f32.mrf.mxu2 }
 0x839   :  { %1861 = vmatmul.msk.f32.gmra.mxu3 %vm240_vm1, %v1173_v49  ;;  %v765_v15 = vadd.f32 %v764_v9, %v2477_v30  ;;  %v2042_v30 = vmov 64.0  }
 0x83a   :  { %v978_v50 = vpop.permute.xlu0 %977  ;;  %2005 = vrcp.f32 %v2042_v30 }
 0x83c   :  { %1840 = vmatpush.xpose.msk.msrb.mxu2 %vm240_vm1, %v978_v50 }
 0x83f   :  { %v1259_v55 = vpop.permute.xlu2 %1258 }
 0x840   :  { %1862 = vmatpush.xpose.msk.msrb.mxu0 %vm240_vm1, %v1259_v55  ;;  %v2006_v48 = vpop.eup %2005 }
 0x841   :  { %v1348_v49 = vmul.f32 64.0, %v2006_v48  ;;  %vm1352_vm2 = vweird.f32 %v2006_v48 }
 0x842   :  { %v974_v24 = vpop.permute.xlu0 %973 }
 0x843   :  { %v1349_v50 = vsub.f32 1.0, %v1348_v49 }
 0x845   :  { %v961_v4 = vpop.f32.mrf.mxu1  ;;  %v1350_v55 = vmul.f32 %v2006_v48, %v1349_v50 }
 0x847   :  { %v976_v56 = vpop.permute.xlu2 %975  ;;  %v1255_v28 = vpop.permute.xlu1 %1254 }
 0x848   :  { %1841 = vmatpush.xpose.msk.msrb.mxu2 %vm240_vm1, %v976_v56  ;;  %v1351_v56 = vadd.f32 %v2006_v48, %v1350_v55 }
 0x84a   :  { %v1253_v60 = vpop.permute.xlu0 %1252 }
 0x84c   :  { %1842 = vmatpush.xpose.msk.msrb.mxu2 %vm240_vm1, %v974_v24  ;;  %v2640_v24 = vsel %vm1352_vm2, %v2006_v48, %v1351_v56  ;;  %v1596_v56 = vld [vmem:[%s2852_s10 + $0x38] sm:$0xff] }
 0x84d   :  { %v964_v5 = vpop.f32.mrf.mxu1 }
 0x84f   :  { %v1257_v57 = vpop.permute.xlu2 %1256  ;;  %v1247_v2 = vpop.permute.xlu1 %1246 }
 0x850   :  { %1863 = vmatpush.xpose.msk.msrb.mxu0 %vm240_vm1, %v1257_v57 }
 0x852   :  { %v1251_v42 = vpop.permute.xlu0 %1250 }
 0x854   :  { %1864 = vmatpush.xpose.msk.msrb.mxu0 %vm240_vm1, %v1255_v28  ;;  %v1459_v28 = vld [vmem:[%s2849_s8 + $0x78] sm:$0xff] }
 0x855   :  { %1874 = vmatpush.xpose.msk.msrb.mxu1 %vm81_vm0, %v1459_v28 }
 0x857   :  { %v972_v58 = vpop.permute.xlu2 %971 }
 0x858   :  { %1843 = vmatpush.xpose.msk.msrb.mxu2 %vm240_vm1, %v972_v58  ;;  %1865 = vmatpush.xpose.msk.msrb.mxu0 %vm240_vm1, %v1253_v60 }
 0x85a   :  { %v1249_v1 = vpop.permute.xlu0 %1248 }
 0x85c   :  { %1866 = vmatpush.xpose.msk.msrb.mxu0 %vm240_vm1, %v1251_v42 }
 0x85f   :  { %v970_v61 = vpop.permute.xlu2 %969 }
 0x860   :  { %1844 = vmatpush.xpose.msk.msrb.mxu2 %vm240_vm1, %v970_v61  ;;  %1867 = vmatpush.xpose.msk.msrb.mxu0 %vm240_vm1, %v1249_v1  ;;  %v1458_v1 = vld [vmem:[%s2849_s8 + $0x70] sm:$0xff] }
 0x861   :  { %1875 = vmatpush.xpose.msk.msrb.mxu1 %vm81_vm0, %v1458_v1 }
 0x864   :  { %1868 = vmatpush.xpose.msk.msrb.mxu0 %vm240_vm1, %v1247_v2 }
 0x867   :  { %v968_v62 = vpop.permute.xlu2 %967 }
 0x868   :  { %1845 = vmatpush.xpose.msk.msrb.mxu2 %vm240_vm1, %v968_v62 }
 0x86b   :  { %1846 = vmatmul.msk.f32.vlgmr.msrb.gmra.mxu2 %vm240_vm1, %v2523_v37 }
 0x86c   :  { %1609 = vmatpush.xpose.msra.mxu2 %v1596_v56 }
 0x86f   :  { %v1245_v3 = vpop.permute.xlu2 %1244 }
 0x870   :  { %1869 = vmatpush.xpose.msk.msrb.mxu0 %vm240_vm1, %v1245_v3 }
 0x873   :  { %1847 = vmatmul.msk.f32.gmra.mxu2 %vm240_vm1, %v2525_v40 }
 0x87b   :  { %1848 = vmatmul.msk.f32.gmra.mxu2 %vm240_vm1, %v961_v4  ;;  %v1457_v4 = vld [vmem:[%s2849_s8 + $0x68] sm:$0xff] }
 0x87c   :  { %1876 = vmatpush.xpose.msk.msrb.mxu1 %vm81_vm0, %v1457_v4 }
 0x883   :  { %1849 = vmatmul.msk.f32.gmra.mxu2 %vm240_vm1, %v964_v5 }
 0x89e   :  { %v1203_v37 = vpop.f32.mrf.mxu1 }
 0x89f   :  { %1870 = vmatmul.msk.f32.vlgmr.msrb.gmra.mxu0 %vm240_vm1, %v1203_v37 }
 0x8a6   :  { %v1206_v6 = vpop.f32.mrf.mxu1 }
 0x8a7   :  { %1871 = vmatmul.msk.f32.gmra.mxu0 %vm240_vm1, %v1206_v6  ;;  %v1456_v6 = vld [vmem:[%s2849_s8 + $0x60] sm:$0xff] }
 0x8a8   :  { %1877 = vmatpush.xpose.msk.msrb.mxu1 %vm81_vm0, %v1456_v6 }
 0x8b4   :  { %v1238_v7 = vpop.f32.mrf.mxu3 }
 0x8b5   :  { %1872 = vmatmul.msk.f32.gmra.mxu0 %vm240_vm1, %v1238_v7  ;;  %v1455_v7 = vld [vmem:[%s2849_s8 + $0x58] sm:$0xff] }
 0x8b6   :  { %1878 = vmatpush.xpose.msk.msrb.mxu1 %vm81_vm0, %v1455_v7 }
 0x8ba   :  { %1879 = vmatpush.xpose.msk.msrb.mxu1 %vm81_vm0, %v1454_v8 }
 0x8bc   :  { %v1241_v40 = vpop.f32.mrf.mxu3 }
 0x8bd   :  { %1873 = vmatmul.msk.f32.gmra.mxu0 %vm240_vm1, %v1241_v40 }
 0x8ee   :  { %v1028_v53 = vpop.f32.mrf.mxu2 }
 0x8ef   :  { %v1040_v13 = vadd.f32 %v1028_v53, %v756_v26  ;;  %v1453_v53 = vld [vmem:[%s2849_s8 + $0x48] sm:$0xff] }
 0x8f0   :  { %1880 = vmatpush.xpose.msk.msrb.mxu1 %vm81_vm0, %v1453_v53 }
 0x8f6   :  { %v1031_v59 = vpop.f32.mrf.mxu2 }
 0x8f7   :  { %v1041_v20 = vadd.f32 %v1031_v59, %v759_v17  ;;  %v1451_v59 = vld [vmem:[%s2849_s8 + $0x38] sm:$0xff] }
 0x8fe   :  { %v1034_v25 = vpop.f32.mrf.mxu2 }
 0x8ff   :  { %v1042_v11 = vadd.f32 %v1034_v25, %v762_v32 }
 0x906   :  { %v1037_v41 = vpop.f32.mrf.mxu2 }
 0x907   :  { %v1043_v38 = vadd.f32 %v1037_v41, %v765_v15 }
 0x91c   :  { %v1305_v54 = vpop.f32.mrf.mxu0 }
 0x91d   :  { %v1317_v29 = vadd.f32 %v1305_v54, %v1040_v13  ;;  %v1452_v54 = vld [vmem:[%s2849_s8 + $0x40] sm:$0xff] }
 0x91e   :  { %1881 = vmatpush.xpose.msk.msrb.mxu1 %vm81_vm0, %v1452_v54 }
 0x91f   :  { %v1325_v16 = vadd.f32 %v1934_v14, %v1317_v29 }
 0x921   :  { %v1329_v19 = vadd.f32 %v2031_v18, %v1325_v16  ;;  %v1450_v18 = vld [vmem:[%s2849_s8 + $0x30] sm:$0xff] }
 0x922   :  { %1882 = vmatpush.xpose.msk.msrb.mxu1 %vm81_vm0, %v1451_v59 }
 0x923   :  { %v1335_v21 = vsel %vm81_vm0, %v1329_v19, 0.0 }
 0x924   :  { %1336 = vadd.xlane.f32.xlu0 %v1335_v21  ;;  %v1308_v23 = vpop.f32.mrf.mxu0  ;;  %v1447_v21 = vld [vmem:[%s2849_s8 + $0x18] sm:$0xff] }
 0x925   :  { %v1318_v22 = vadd.f32 %v1308_v23, %v1041_v20  ;;  %v1448_v20 = vld [vmem:[%s2849_s8 + $0x20] sm:$0xff]  ;;  %v1446_v23 = vld [vmem:[%s2849_s8 + $0x10] sm:$0xff] }
 0x926   :  { %1883 = vmatpush.xpose.msk.msrb.mxu1 %vm81_vm0, %v1450_v18 }
 0x927   :  { %v1326_v31 = vadd.f32 %v1934_v14, %v1318_v22  ;;  %v1445_v22 = vld [vmem:[%s2849_s8 + $0x8] sm:$0xff] }
 0x929   :  { %v1330_v34 = vadd.f32 %v2032_v33, %v1326_v31  ;;  %v1444_v31 = vld [vmem:[%s2849_s8] sm:$0xff] }
 0x92b   :  { %v1338_v36 = vsel %vm81_vm0, %v1330_v34, 0.0 }
 0x92c   :  { %1339 = vadd.xlane.f32.xlu1 %v1338_v36 }
 0x932   :  { %v1311_v12 = vpop.f32.mrf.mxu0 }
 0x933   :  { %v1319_v63 = vadd.f32 %v1311_v12, %v1042_v11 }
 0x935   :  { %v1327_v43 = vadd.f32 %v1934_v14, %v1319_v63 }
 0x937   :  { %v1331_v35 = vadd.f32 %v2033_v44, %v1327_v43 }
 0x939   :  { %v1341_v0 = vsel %vm81_vm0, %v1331_v35, 0.0 }
 0x93a   :  { %1342 = vadd.xlane.f32.xlu2 %v1341_v0  ;;  %v1314_v45 = vpop.f32.mrf.mxu0  ;;  %v1935_v0 = vld [vmem:[%s2848_s6] ss:$0 sm:$0xff] }
 0x93b   :  { %v1320_v39 = vadd.f32 %v1314_v45, %v1043_v38 }
 0x93d   :  { %v1328_v10 = vadd.f32 %v1934_v14, %v1320_v39 }
 0x93f   :  { %v1332_v46 = vadd.f32 %v2034_v27, %v1328_v10 }
 0x941   :  { %v1344_v47 = vsel %vm81_vm0, %v1332_v46, 0.0 }
 0x942   :  { %1345 = vadd.xlane.f32.xlu0 %v1344_v47  ;;  %v1936_v47 = vld [vmem:[%s2850_s7] ss:$0 sm:$0xff] }
 0x997   :  { %v1337_v57 = vpop.xlane.xlu0 %1336 }
 0x998   :  { %v1354_v58 = vmul.f32 %v2640_v24, %v1337_v57 }
 0x99a   :  { %v2643_v60 = vsub.f32 %v1329_v19, %v1354_v58  ;;  %v1449_v19 = vld [vmem:[%s2849_s8 + $0x28] sm:$0xff]  ;;  %v1595_v58 = vld [vmem:[%s2852_s10 + $0x30] sm:$0xff] }
 0x99b   :  { %1884 = vmatpush.xpose.msk.msrb.mxu1 %vm81_vm0, %v1449_v19  ;;  %1610 = vmatpush.xpose.msra.mxu2 %v1595_v58 }
 0x99c   :  { %v1362_v61 = vmul.f32 %v2643_v60, %v2643_v60 }
 0x99e   :  { %v1366_v42 = vsel %vm81_vm0, %v1362_v61, 0.0 }
 0x99f   :  { %1367 = vadd.xlane.f32.xlu1 %v1366_v42  ;;  %v1340_v62 = vpop.xlane.xlu1 %1339  ;;  %1885 = vmatpush.xpose.msk.msrb.mxu1 %vm81_vm0, %v1448_v20  ;;  %v1593_v20 = vld [vmem:[%s2852_s10 + $0x20] sm:$0xff] }
 0x9a0   :  { %v1355_v2 = vmul.f32 %v2640_v24, %v1340_v62 }
 0x9a2   :  { %v2656_v3 = vsub.f32 %v1330_v34, %v1355_v2 }
 0x9a3   :  { %1886 = vmatpush.xpose.msk.msrb.mxu1 %vm81_vm0, %v1447_v21  ;;  %v1591_v21 = vld [vmem:[%s2852_s10 + $0x10] sm:$0xff] }
 0x9a4   :  { %v1363_v5 = vmul.f32 %v2656_v3, %v2656_v3 }
 0x9a6   :  { %v1369_v37 = vsel %vm81_vm0, %v1363_v5, 0.0 }
 0x9a7   :  { %1370 = vadd.xlane.f32.xlu2 %v1369_v37  ;;  %1887 = vmatpush.xpose.msk.msrb.mxu1 %vm81_vm0, %v1446_v23  ;;  %v1590_v23 = vld [vmem:[%s2852_s10 + $0x8] sm:$0xff] }
 0x9ab   :  { %1888 = vmatpush.xpose.msk.msrb.mxu1 %vm81_vm0, %v1445_v22  ;;  %v1589_v22 = vld [vmem:[%s2852_s10] sm:$0xff] }
 0x9ad   :  { %v1343_v40 = vpop.xlane.xlu2 %1342 }
 0x9ae   :  { %v1356_v51 = vmul.f32 %v2640_v24, %v1343_v40 }
 0x9af   :  { %1889 = vmatpush.xpose.msk.msrb.mxu1 %vm81_vm0, %v1444_v31  ;;  %v1937_v31 = vld [vmem:[%s2851_s9] ss:$0 sm:$0xff] }
 0x9b0   :  { %v2678_v52 = vsub.f32 %v1331_v35, %v1356_v51 }
 0x9b2   :  { %v1364_v9 = vmul.f32 %v2678_v52, %v2678_v52 }
 0x9b4   :  { %v1372_v26 = vsel %vm81_vm0, %v1364_v9, 0.0 }
 0x9b5   :  { %1373 = vadd.xlane.f32.xlu0 %v1372_v26  ;;  %v1346_v13 = vpop.xlane.xlu0 %1345 }
 0x9b6   :  { %v1357_v14 = vmul.f32 %v2640_v24, %v1346_v13 }
 0x9b8   :  { %v2692_v29 = vsub.f32 %v1332_v46, %v1357_v14 }
 0x9ba   :  { %v1365_v16 = vmul.f32 %v2692_v29, %v2692_v29 }
 0x9bc   :  { %v1375_v17 = vsel %vm81_vm0, %v1365_v16, 0.0 }
 0x9bd   :  { %1376 = vadd.xlane.f32.xlu1 %v1375_v17 }
 0xa12   :  { %v1368_v33 = vpop.xlane.xlu1 %1367 }
 0xa13   :  { %v1378_v34 = vmul.f32 %v1368_v33, %v2640_v24 }
 0xa15   :  { %v1382_v36 = vadd.f32 1e-12, %v1378_v34 }
 0xa17   :  { %2007 = vrsqrt.f32 %v1382_v36  ;;  %vm1392_vm4 = vweird.f32 %v1382_v36 }
 0xa1a   :  { %v1371_v25 = vpop.xlane.xlu2 %1370 }
 0xa1b   :  { %v1379_v32 = vmul.f32 %v1371_v25, %v2640_v24 }
 0xa1d   :  { %v2008_v11 = vpop.eup %2007  ;;  %v1383_v12 = vadd.f32 1e-12, %v1379_v32 }
 0xa1e   :  { %v1387_v63 = vmul.f32 %v2008_v11, %v1382_v36  ;;  %vm1393_vm3 = vweird.f32 %v2008_v11 }
 0xa1f   :  { %2009 = vrsqrt.f32 %v1383_v12  ;;  %vm1394_vm5 = vmor %vm1392_vm4, %vm1393_vm3  ;;  %vm1402_vm7 = vweird.f32 %v1383_v12 }
 0xa20   :  { %v1388_v43 = vmul.f32 %v2008_v11, %v1387_v63 }
 0xa22   :  { %v1389_v41 = vmul.f32 0.5, %v1388_v43 }
 0xa24   :  { %v1390_v15 = vsub.f32 1.5, %v1389_v41 }
 0xa25   :  { %v2010_v44 = vpop.eup %2009 }
 0xa26   :  { %v1391_v35 = vmul.f32 %v2008_v11, %v1390_v15  ;;  %v1397_v38 = vmul.f32 %v2010_v44, %v1383_v12  ;;  %vm1403_vm6 = vweird.f32 %v2010_v44 }
 0xa27   :  { %vm1404_vm8 = vmor %vm1402_vm7, %vm1403_vm6 }
 0xa28   :  { %v1395_v45 = vsel %vm1394_vm5, %v2008_v11, %v1391_v35  ;;  %v1398_v39 = vmul.f32 %v2010_v44, %v1397_v38  ;;  %v1374_v10 = vpop.xlane.xlu0 %1373 }
 0xa29   :  { %v1426_v27 = vmul.f32 %v1395_v45, %v2643_v60  ;;  %v1380_v46 = vmul.f32 %v1374_v10, %v2640_v24 }
 0xa2a   :  { %v1399_v30 = vmul.f32 0.5, %v1398_v39 }
 0xa2b   :  { %v1433_v48 = vmul.f32 %v1935_v0, %v1426_v27  ;;  %v1384_v49 = vadd.f32 1e-12, %v1380_v46 }
 0xa2c   :  { %v1400_v50 = vsub.f32 1.5, %v1399_v30 }
 0xa2d   :  { %2011 = vrsqrt.f32 %v1384_v49  ;;  %v2740_v55 = vadd.f32 %v1936_v47, %v1433_v48  ;;  %vm1412_vm10 = vweird.f32 %v1384_v49 }
 0xa2e   :  { %v1401_v57 = vmul.f32 %v2010_v44, %v1400_v50 }
 0xa2f   :  { %1890 = vmatmul.msk.f32.vlgmr.msrb.gmra.mxu1 %vm81_vm0, %v2740_v55 }
 0xa30   :  { %v1405_v60 = vsel %vm1404_vm8, %v2010_v44, %v1401_v57  ;;  %v1377_v61 = vpop.xlane.xlu1 %1376 }
 0xa31   :  { %v1381_v28 = vmul.f32 %v1377_v61, %v2640_v24  ;;  %v1427_v42 = vmul.f32 %v1405_v60, %v2656_v3 }
 0xa33   :  { %v2012_v62 = vpop.eup %2011  ;;  %v1385_v1 = vadd.f32 1e-12, %v1381_v28  ;;  %v1434_v2 = vmul.f32 %v1935_v0, %v1427_v42 }
 0xa34   :  { %v1407_v4 = vmul.f32 %v2012_v62, %v1384_v49  ;;  %vm1413_vm9 = vweird.f32 %v2012_v62 }
 0xa35   :  { %2013 = vrsqrt.f32 %v1385_v1  ;;  %v2752_v5 = vadd.f32 %v1936_v47, %v1434_v2  ;;  %vm1414_vm11 = vmor %vm1412_vm10, %vm1413_vm9  ;;  %vm1422_vm13 = vweird.f32 %v1385_v1 }
 0xa36   :  { %v1408_v37 = vmul.f32 %v2012_v62, %v1407_v4 }
 0xa37   :  { %1891 = vmatmul.msk.f32.gmra.mxu1 %vm81_vm0, %v2752_v5 }
 0xa38   :  { %v1409_v6 = vmul.f32 0.5, %v1408_v37 }
 0xa3a   :  { %v1410_v7 = vsub.f32 1.5, %v1409_v6 }
 0xa3b   :  { %v2014_v40 = vpop.eup %2013 }
 0xa3c   :  { %v1411_v51 = vmul.f32 %v2012_v62, %v1410_v7  ;;  %v1417_v8 = vmul.f32 %v2014_v40, %v1385_v1  ;;  %vm1423_vm12 = vweird.f32 %v2014_v40 }
 0xa3d   :  { %vm1424_vm14 = vmor %vm1422_vm13, %vm1423_vm12 }
 0xa3e   :  { %v1415_v3 = vsel %vm1414_vm11, %v2012_v62, %v1411_v51  ;;  %v1418_v9 = vmul.f32 %v2014_v40, %v1417_v8 }
 0xa3f   :  { %v1428_v53 = vmul.f32 %v1415_v3, %v2678_v52  ;;  %v1594_v52 = vld [vmem:[%s2852_s10 + $0x28] sm:$0xff] }
 0xa40   :  { %v1419_v26 = vmul.f32 0.5, %v1418_v9  ;;  %1611 = vmatpush.xpose.msra.mxu2 %v1594_v52 }
 0xa41   :  { %v1435_v13 = vmul.f32 %v1935_v0, %v1428_v53  ;;  %v1938_v53 = vld [vmem:[%s2853_s11] ss:$0 sm:$0xff] }
 0xa42   :  { %v1420_v14 = vsub.f32 1.5, %v1419_v26 }
 0xa43   :  { %v2757_v54 = vadd.f32 %v1936_v47, %v1435_v13 }
 0xa44   :  { %v1421_v16 = vmul.f32 %v2014_v40, %v1420_v14  ;;  %1612 = vmatpush.xpose.msra.mxu2 %v1593_v20 }
 0xa45   :  { %1892 = vmatmul.msk.f32.gmra.mxu1 %vm81_vm0, %v2757_v54 }
 0xa46   :  { %v1425_v59 = vsel %vm1424_vm14, %v2014_v40, %v1421_v16 }
 0xa47   :  { %v1429_v17 = vmul.f32 %v1425_v59, %v2692_v29  ;;  %v1592_v29 = vld [vmem:[%s2852_s10 + $0x18] sm:$0xff] }
 0xa48   :  { %1613 = vmatpush.xpose.msra.mxu2 %v1592_v29 }
 0xa49   :  { %v1436_v18 = vmul.f32 %v1935_v0, %v1429_v17 }
 0xa4b   :  { %v2762_v19 = vadd.f32 %v1936_v47, %v1436_v18 }
 0xa4c   :  { %1614 = vmatpush.xpose.msra.mxu2 %v1591_v21 }
 0xa4d   :  { %1893 = vmatmul.msk.f32.gmra.mxu1 %vm81_vm0, %v2762_v19 }
 0xa50   :  { %1615 = vmatpush.xpose.msra.mxu2 %v1590_v23 }
 0xa54   :  { %1616 = vmatpush.xpose.msra.mxu2 %v1589_v22 }
 0xaac   :  { %v1541_v33 = vpop.f32.mrf.mxu1 }
 0xaad   :  { %v1542_v34 = vadd.f32 %v1937_v31, %v1541_v33 }
 0xaaf   :  { %v1553_v36 = vmul.f32 %v1542_v34, %v1542_v34 }
 0xab1   :  { %v1557_v25 = vmul.f32 %v1553_v36, %v1542_v34 }
 0xab3   :  { %v1561_v32 = vmul.f32 0.044715, %v1557_v25 }
 0xab4   :  { %v1544_v11 = vpop.f32.mrf.mxu1 }
 0xab5   :  { %v1565_v12 = vadd.f32 %v1561_v32, %v1542_v34  ;;  %v1545_v63 = vadd.f32 %v1937_v31, %v1544_v11 }
 0xab7   :  { %v1569_v43 = vmul.f32 0.7978846, %v1565_v12  ;;  %v1554_v41 = vmul.f32 %v1545_v63, %v1545_v63 }
 0xab9   :  { %2015 = vtanh.f32 %v1569_v43  ;;  %v1558_v15 = vmul.f32 %v1554_v41, %v1545_v63 }
 0xabb   :  { %v1562_v44 = vmul.f32 0.044715, %v1558_v15 }
 0xabd   :  { %v1566_v35 = vadd.f32 %v1562_v44, %v1545_v63 }
 0xabf   :  { %v2016_v38 = vpop.eup %2015  ;;  %v1570_v0 = vmul.f32 0.7978846, %v1566_v35 }
 0xac0   :  { %v1577_v45 = vadd.f32 1.0, %v2016_v38 }
 0xac1   :  { %2017 = vtanh.f32 %v1570_v0 }
 0xac2   :  { %v1547_v39 = vpop.f32.mrf.mxu1  ;;  %v1581_v10 = vmul.f32 0.5, %v1577_v45 }
 0xac3   :  { %v1548_v27 = vadd.f32 %v1937_v31, %v1547_v39 }
 0xac4   :  { %v1585_v46 = vmul.f32 %v1581_v10, %v1542_v34 }
 0xac5   :  { %v1555_v47 = vmul.f32 %v1548_v27, %v1548_v27 }
 0xac6   :  { %1617 = vmatmul.f32.vlgmr.msra.gmra.mxu2 %v1585_v46 }
 0xac7   :  { %v2018_v30 = vpop.eup %2017  ;;  %v1559_v48 = vmul.f32 %v1555_v47, %v1548_v27 }
 0xac8   :  { %v1578_v49 = vadd.f32 1.0, %v2018_v30 }
 0xac9   :  { %v1563_v50 = vmul.f32 0.044715, %v1559_v48 }
 0xaca   :  { %v1550_v56 = vpop.f32.mrf.mxu1  ;;  %v1582_v57 = vmul.f32 0.5, %v1578_v49 }
 0xacb   :  { %v1551_v58 = vadd.f32 %v1937_v31, %v1550_v56  ;;  %v1567_v60 = vadd.f32 %v1563_v50, %v1548_v27 }
 0xacc   :  { %v1586_v61 = vmul.f32 %v1582_v57, %v1545_v63 }
 0xacd   :  { %v1556_v28 = vmul.f32 %v1551_v58, %v1551_v58  ;;  %v1571_v42 = vmul.f32 0.7978846, %v1567_v60 }
 0xace   :  { %1620 = vmatmul.f32.gmra.mxu2 %v1586_v61 }
 0xacf   :  { %v1560_v62 = vmul.f32 %v1556_v28, %v1551_v58  ;;  %2019 = vtanh.f32 %v1571_v42 }
 0xad1   :  { %v1564_v1 = vmul.f32 0.044715, %v1560_v62  ;;  %v1939_v62 = vld [vmem:[%s2854_s12] ss:$0 sm:$0xff] }
 0xad3   :  { %v1568_v2 = vadd.f32 %v1564_v1, %v1551_v58 }
 0xad5   :  { %v2020_v4 = vpop.eup %2019  ;;  %v1572_v37 = vmul.f32 0.7978846, %v1568_v2 }
 0xad6   :  { %v1579_v6 = vadd.f32 1.0, %v2020_v4 }
 0xad7   :  { %2021 = vtanh.f32 %v1572_v37  ;;  %v1940_v37 = vld [vmem:[%s2855_s13] ss:$0 sm:$0xff] }
 0xad8   :  { %v1583_v7 = vmul.f32 0.5, %v1579_v6 }
 0xada   :  { %v1587_v40 = vmul.f32 %v1583_v7, %v1548_v27 }
 0xadc   :  { %1623 = vmatmul.f32.gmra.mxu2 %v1587_v40 }
 0xadd   :  { %v2022_v51 = vpop.eup %2021 }
 0xade   :  { %v1580_v8 = vadd.f32 1.0, %v2022_v51 }
 0xae0   :  { %v1584_v3 = vmul.f32 0.5, %v1580_v8 }
 0xae2   :  { %v1588_v9 = vmul.f32 %v1584_v3, %v1551_v58 }
 0xae4   :  { %1626 = vmatmul.f32.gmra.mxu2 %v1588_v9 }
 0xb49   :  { %v1618_v26 = vpop.f32.mrf.mxu2 }
 0xb4a   :  { %v1619_v13 = vadd.f32 %v1938_v53, %v1618_v26 }
 0xb4c   :  { %v1630_v14 = vadd.f32 %v1619_v13, %v2740_v55 }
 0xb4e   :  { %v1636_v16 = vsel %vm81_vm0, %v1630_v14, 0.0 }
 0xb4f   :  { %1637 = vadd.xlane.f32.xlu2 %v1636_v16 }
 0xb51   :  { %v1621_v59 = vpop.f32.mrf.mxu2 }
 0xb52   :  { %v1622_v17 = vadd.f32 %v1938_v53, %v1621_v59 }
 0xb54   :  { %v1631_v18 = vadd.f32 %v1622_v17, %v2752_v5 }
 0xb56   :  { %v1639_v52 = vsel %vm81_vm0, %v1631_v18, 0.0 }
 0xb57   :  { %1640 = vadd.xlane.f32.xlu0 %v1639_v52 }
 0xb5f   :  { %v1624_v20 = vpop.f32.mrf.mxu2 }
 0xb60   :  { %v1625_v29 = vadd.f32 %v1938_v53, %v1624_v20 }
 0xb62   :  { %v1632_v21 = vadd.f32 %v1625_v29, %v2757_v54 }
 0xb64   :  { %v1642_v23 = vsel %vm81_vm0, %v1632_v21, 0.0 }
 0xb65   :  { %1643 = vadd.xlane.f32.xlu1 %v1642_v23 }
 0xb67   :  { %v1627_v22 = vpop.f32.mrf.mxu2 }
 0xb68   :  { %v1628_v31 = vadd.f32 %v1938_v53, %v1627_v22 }
 0xb6a   :  { %v1633_v55 = vadd.f32 %v1628_v31, %v2762_v19 }
 0xb6c   :  { %v1645_v33 = vsel %vm81_vm0, %v1633_v55, 0.0 }
 0xb6d   :  { %1646 = vadd.xlane.f32.xlu2 %v1645_v33 }
 0xbc2   :  { %v1638_v34 = vpop.xlane.xlu2 %1637 }
 0xbc3   :  { %v1648_v5 = vmul.f32 %v1638_v34, %v2640_v24 }
 0xbc5   :  { %v1652_v36 = vsub.f32 %v1630_v14, %v1648_v5 }
 0xbc7   :  { %v1656_v25 = vmul.f32 %v1652_v36, %v1652_v36 }
 0xbc9   :  { %v1660_v32 = vsel %vm81_vm0, %v1656_v25, 0.0 }
 0xbca   :  { %1661 = vadd.xlane.f32.xlu0 %v1660_v32  ;;  %v1641_v11 = vpop.xlane.xlu0 %1640 }
 0xbcb   :  { %v1649_v54 = vmul.f32 %v1641_v11, %v2640_v24 }
 0xbcd   :  { %v1653_v12 = vsub.f32 %v1631_v18, %v1649_v54 }
 0xbcf   :  { %v1657_v63 = vmul.f32 %v1653_v12, %v1653_v12 }
 0xbd1   :  { %v1663_v43 = vsel %vm81_vm0, %v1657_v63, 0.0 }
 0xbd2   :  { %1664 = vadd.xlane.f32.xlu1 %v1663_v43 }
 0xbd8   :  { %v1644_v19 = vpop.xlane.xlu1 %1643 }
 0xbd9   :  { %v1650_v41 = vmul.f32 %v1644_v19, %v2640_v24 }
 0xbdb   :  { %v2803_v15 = vsub.f32 %v1632_v21, %v1650_v41 }
 0xbdd   :  { %v1658_v44 = vmul.f32 %v2803_v15, %v2803_v15 }
 0xbdf   :  { %v1666_v35 = vsel %vm81_vm0, %v1658_v44, 0.0 }
 0xbe0   :  { %v1647_v38 = vpop.xlane.xlu2 %1646  ;;  %1667 = vadd.xlane.f32.xlu2 %v1666_v35 }
 0xbe1   :  { %v1651_v0 = vmul.f32 %v1647_v38, %v2640_v24 }
 0xbe3   :  { %v2809_v45 = vsub.f32 %v1633_v55, %v1651_v0 }
 0xbe5   :  { %v1659_v39 = vmul.f32 %v2809_v45, %v2809_v45 }
 0xbe7   :  { %v1669_v10 = vsel %vm81_vm0, %v1659_v39, 0.0 }
 0xbe8   :  { %1670 = vadd.xlane.f32.xlu0 %v1669_v10 }
 0xc3d   :  { %v1662_v27 = vpop.xlane.xlu0 %1661 }
 0xc3e   :  { %v1672_v46 = vmul.f32 %v1662_v27, %v2640_v24 }
 0xc40   :  { %v1676_v47 = vadd.f32 1e-12, %v1672_v46 }
 0xc42   :  { %2023 = vrsqrt.f32 %v1676_v47  ;;  %vm1686_vm1 = vweird.f32 %v1676_v47 }
 0xc45   :  { %v1665_v30 = vpop.xlane.xlu1 %1664 }
 0xc46   :  { %v1673_v48 = vmul.f32 %v1665_v30, %v2640_v24 }
 0xc48   :  { %v2024_v49 = vpop.eup %2023  ;;  %v1677_v50 = vadd.f32 1e-12, %v1673_v48 }
 0xc49   :  { %v1681_v56 = vmul.f32 %v2024_v49, %v1676_v47  ;;  %vm1687_vm15 = vweird.f32 %v2024_v49 }
 0xc4a   :  { %2025 = vrsqrt.f32 %v1677_v50  ;;  %vm1688_vm2 = vmor %vm1686_vm1, %vm1687_vm15  ;;  %vm1696_vm4 = vweird.f32 %v1677_v50 }
 0xc4b   :  { %v1682_v57 = vmul.f32 %v2024_v49, %v1681_v56 }
 0xc4d   :  { %v1683_v58 = vmul.f32 0.5, %v1682_v57 }
 0xc4f   :  { %v1684_v60 = vsub.f32 1.5, %v1683_v58 }
 0xc50   :  { %v2026_v61 = vpop.eup %2025 }
 0xc51   :  { %v1685_v28 = vmul.f32 %v2024_v49, %v1684_v60  ;;  %v1691_v42 = vmul.f32 %v2026_v61, %v1677_v50  ;;  %vm1697_vm3 = vweird.f32 %v2026_v61 }
 0xc52   :  { %vm1698_vm5 = vmor %vm1696_vm4, %vm1697_vm3 }
 0xc53   :  { %v1689_v1 = vsel %vm1688_vm2, %v2024_v49, %v1685_v28  ;;  %v1692_v2 = vmul.f32 %v2026_v61, %v1691_v42  ;;  %v1668_v4 = vpop.xlane.xlu2 %1667 }
 0xc54   :  { %v1720_v6 = vmul.f32 %v1689_v1, %v1652_v36  ;;  %v1674_v7 = vmul.f32 %v1668_v4, %v2640_v24 }
 0xc55   :  { %v1693_v40 = vmul.f32 0.5, %v1692_v2 }
 0xc56   :  { %v1727_v51 = vmul.f32 %v1939_v62, %v1720_v6  ;;  %v1678_v8 = vadd.f32 1e-12, %v1674_v7 }
 0xc57   :  { %v1694_v3 = vsub.f32 1.5, %v1693_v40 }
 0xc58   :  { %v1734_v9 = vadd.f32 %v1940_v37, %v1727_v51  ;;  %2027 = vrsqrt.f32 %v1678_v8  ;;  %vm1706_vm7 = vweird.f32 %v1678_v8 }
 0xc59   :  { %v1695_v53 = vmul.f32 %v2026_v61, %v1694_v3 }
 0xc5a   :  { %1738 = vst.msk [vmem:[%s2856_s14] sm:$0xff] %vm81_vm0, %v1734_v9 }
 0xc5b   :  { %v1699_v26 = vsel %vm1698_vm5, %v2026_v61, %v1695_v53  ;;  %v1671_v13 = vpop.xlane.xlu0 %1670 }
 0xc5c   :  { %v1721_v14 = vmul.f32 %v1699_v26, %v1653_v12  ;;  %v1675_v16 = vmul.f32 %v1671_v13, %v2640_v24 }
 0xc5e   :  { %v2028_v59 = vpop.eup %2027  ;;  %v1728_v17 = vmul.f32 %v1939_v62, %v1721_v14  ;;  %v1679_v18 = vadd.f32 1e-12, %v1675_v16 }
 0xc5f   :  { %v1701_v52 = vmul.f32 %v2028_v59, %v1678_v8  ;;  %vm1707_vm6 = vweird.f32 %v2028_v59 }
 0xc60   :  { %v1735_v20 = vadd.f32 %v1940_v37, %v1728_v17  ;;  %2029 = vrsqrt.f32 %v1679_v18  ;;  %vm1708_vm8 = vmor %vm1706_vm7, %vm1707_vm6  ;;  %vm1716_vm10 = vweird.f32 %v1679_v18 }
 0xc61   :  { %v1702_v29 = vmul.f32 %v2028_v59, %v1701_v52 }
 0xc62   :  { %1739 = vst.msk [vmem:[%s2856_s14 + $0x8] sm:$0xff] %vm81_vm0, %v1735_v20 }
 0xc63   :  { %v1703_v21 = vmul.f32 0.5, %v1702_v29 }
 0xc65   :  { %v1704_v23 = vsub.f32 1.5, %v1703_v21 }
 0xc66   :  { %v2030_v22 = vpop.eup %2029 }
 0xc67   :  { %v1705_v31 = vmul.f32 %v2028_v59, %v1704_v23  ;;  %v1711_v55 = vmul.f32 %v2030_v22, %v1679_v18  ;;  %vm1717_vm9 = vweird.f32 %v2030_v22 }
 0xc68   :  { %vm1718_vm11 = vmor %vm1716_vm10, %vm1717_vm9 }
 0xc69   :  { %v1709_v24 = vsel %vm1708_vm8, %v2028_v59, %v1705_v31  ;;  %v1712_v33 = vmul.f32 %v2030_v22, %v1711_v55 }
 0xc6a   :  { %v1722_v34 = vmul.f32 %v1709_v24, %v2803_v15 }
 0xc6b   :  { %v1713_v5 = vmul.f32 0.5, %v1712_v33 }
 0xc6c   :  { %v1729_v36 = vmul.f32 %v1939_v62, %v1722_v34 }
 0xc6d   :  { %v1714_v25 = vsub.f32 1.5, %v1713_v5 }
 0xc6e   :  { %v1736_v32 = vadd.f32 %v1940_v37, %v1729_v36 }
 0xc6f   :  { %v1715_v11 = vmul.f32 %v2030_v22, %v1714_v25 }
 0xc70   :  { %1740 = vst.msk [vmem:[%s2856_s14 + $0x10] sm:$0xff] %vm81_vm0, %v1736_v32 }
 0xc71   :  { %v1719_v54 = vsel %vm1718_vm11, %v2030_v22, %v1715_v11 }
 0xc72   :  { %v1723_v12 = vmul.f32 %v1719_v54, %v2809_v45 }
 0xc74   :  { %v1730_v63 = vmul.f32 %v1939_v62, %v1723_v12 }
 0xc76   :  { %v1737_v43 = vadd.f32 %v1940_v37, %v1730_v63 }
 0xc78   :  { %1741 = vst.msk [vmem:[%s2856_s14 + $0x18] sm:$0xff] %vm81_vm0, %v1737_v43 }

</bundles_post_ra>
